<compile_context>
chip_gen: v6e
topology: v6e:2x2x1
jax: 0.10.0
libtpu: 0.0.40
codegen_flags: <defaults>
</compile_context>

<pallas_src>
import functools

import numpy as np

import jax
import jax.numpy as jnp
from jax.experimental import pallas as pl
from jax.experimental.pallas import tpu as pltpu

_BN_EPS = 1e-5


# --------------------------------- kernel ----------------------------------

def _segnet_enc_kernel(x_ref, w_ref, s_ref, b_ref, o_ref, buf_ref,
                       *, H, W, Cmax, L):
    """Fused SegNetEnc forward for ONE image (grid iterates over batch).

    Layout: channels-last, lane-dense.  A padded activation row is stored as
    (W+2)*Cmax f32 lanes; the whole padded activation lives in buf_ref.
    Each 3x3 conv layer = 3 matmuls (one per dy tap row):
        acc[h, w*Cmax+co] += buf[h+dy, :] @ Wdy[:, w*Cmax+co]
    where Wdy is a host-precomputed ((W+2)*Cmax, W*Cmax) block-Toeplitz matrix
    folding the dx shift and the Cin->Cout mixing.  BN(eval)+bias+ReLU is one
    full-lane FMA + max with pre-tiled scale/bias.

    x_ref  : (1, H, W*Cmax)              channel-padded, lane-dense input
    w_ref  : (L, 3, (W+2)*Cmax, W*Cmax)  expanded per-layer/per-dy weights
    s_ref  : (L, 1, W*Cmax)              fused BN scale, tiled across W
    b_ref  : (L, 1, W*Cmax)              fused BN bias (conv bias folded in)
    o_ref  : (1, H, W*Cmax)              lane-dense output of last layer
    buf_ref: (H+2, (W+2)*Cmax)           VMEM scratch (SAME padding lives here)
    """
    WC = W * Cmax
    zpad = jnp.zeros((H, Cmax), jnp.float32)

    def put_interior(val):
        # Full-lane-width (aligned) store of rows 1..H; spatial side halos are
        # (re-)written as zeros, top/bottom halo rows stay zero from init.
        buf_ref[pl.ds(1, H), :] = jnp.concatenate([zpad, val, zpad], axis=1)

    buf_ref[...] = jnp.zeros_like(buf_ref)   # zero halos (once per image)
    put_interior(x_ref[0])

    for l in range(L):                       # static layer loop (L is small)
        acc = jnp.zeros((H, WC), jnp.float32)
        for dy in range(3):                  # 3 matmuls per layer
            acc = acc + jnp.dot(buf_ref[pl.ds(dy, H), :], w_ref[l, dy],
                                preferred_element_type=jnp.float32)
        # fused BatchNorm(eval) + conv bias + ReLU (padded channels stay 0).
        y = jnp.maximum(acc * s_ref[l] + b_ref[l], 0.0)
        if l < L - 1:
            put_interior(y)                  # feed next layer (stays in VMEM)
        else:
            o_ref[0] = y                     # lane-dense (H, 128) store


# --------------------------------- wrapper ----------------------------------

@functools.partial(jax.jit, static_argnames=("out_channels",))
def segnet_enc_forward_nchw(x_nchw, w_big, s_big, b_big, *, out_channels):
    """Matches SegNetEnc.forward on NCHW input; returns NCHW output."""
    N, Cin0, H, W = x_nchw.shape
    L = w_big.shape[0]
    WC = w_big.shape[-1]
    Cmax = WC // W

    # Boundary layout plumbing: NCHW -> lane-dense channel-padded (N, H, W*Cmax)
    x = jnp.transpose(x_nchw, (0, 2, 3, 1))
    if Cmax > Cin0:
        x = jnp.pad(x, ((0, 0), (0, 0), (0, 0), (0, Cmax - Cin0)))
    x = x.reshape(N, H, WC)

    kernel = functools.partial(_segnet_enc_kernel, H=H, W=W, Cmax=Cmax, L=L)
    out = pl.pallas_call(
        kernel,
        out_shape=jax.ShapeDtypeStruct((N, H, WC), jnp.float32),
        grid=(N,),
        in_specs=[
            pl.BlockSpec((1, H, WC), lambda n: (n, 0, 0)),
            pl.BlockSpec((L, 3, (W + 2) * Cmax, WC), lambda n: (0, 0, 0, 0)),
            pl.BlockSpec((L, 1, WC), lambda n: (0, 0, 0)),
            pl.BlockSpec((L, 1, WC), lambda n: (0, 0, 0)),
        ],
        out_specs=pl.BlockSpec((1, H, WC), lambda n: (n, 0, 0)),
        scratch_shapes=[pltpu.VMEM((H + 2, (W + 2) * Cmax), jnp.float32)],
        compiler_params=pltpu.CompilerParams(
            dimension_semantics=("parallel",)),
    )(x, w_big, s_big, b_big)

    out = out.reshape(N, H, W, Cmax)[..., :out_channels]
    return jnp.transpose(out, (0, 3, 1, 2))   # NHWC -> NCHW


# ----------------------------- parameter setup ------------------------------

def _make_layer_params(key, cin, cout):
    """Synthetic params for Conv2d(cin,cout,3,pad=1) + BatchNorm2d(cout) (eval)."""
    k = jax.random.split(key, 6)
    w = 0.1 * jax.random.normal(k[0], (3, 3, cin, cout), jnp.float32)   # HWIO
    conv_b = 0.1 * jax.random.normal(k[1], (cout,), jnp.float32)
    gamma = jax.random.uniform(k[2], (cout,), jnp.float32, 0.5, 1.5)
    beta = 0.1 * jax.random.normal(k[3], (cout,), jnp.float32)
    run_mean = 0.1 * jax.random.normal(k[4], (cout,), jnp.float32)
    run_var = jax.random.uniform(k[5], (cout,), jnp.float32, 0.5, 1.5)
    scale = gamma / jnp.sqrt(run_var + _BN_EPS)
    bias = scale * (conv_b - run_mean) + beta
    return w, scale, bias


def make_segnet_enc_params(key, in_channels, out_channels, num_layers):
    mid = in_channels // 2
    channel_pairs = [(in_channels, mid)]
    channel_pairs += [(mid, mid)] * num_layers
    channel_pairs += [(mid, out_channels)]
    keys = jax.random.split(key, len(channel_pairs))
    return [_make_layer_params(k, ci, co) for k, (ci, co) in zip(keys, channel_pairs)]


def expand_segnet_params(layer_params, W):
    """Host-side expansion to the kernel's lane-dense layout.

    Returns:
      w_big: (L, 3, (W+2)*Cmax, W*Cmax)  block-Toeplitz weights per layer/dy
      s_big: (L, 1, W*Cmax)              BN scale tiled across W (pad chans: 0)
      b_big: (L, 1, W*Cmax)              BN bias  tiled across W (pad chans: 0)
    """
    chans = [layer_params[0][0].shape[2]] + [p[0].shape[3] for p in layer_params]
    Cmax = max(chans)
    L = len(layer_params)
    WC = W * Cmax
    w_big = np.zeros((L, 3, (W + 2) * Cmax, WC), np.float32)
    s_big = np.zeros((L, 1, WC), np.float32)
    b_big = np.zeros((L, 1, WC), np.float32)
    for l, (w_hwio, scale, bias) in enumerate(layer_params):
        cin, cout = w_hwio.shape[2], w_hwio.shape[3]
        w_np = np.asarray(w_hwio, np.float32)
        for dy in range(3):
            for dx in range(3):
                for col in range(W):
                    p = col + dx            # padded input position this tap reads
                    w_big[l, dy,
                          p * Cmax:p * Cmax + cin,
                          col * Cmax:col * Cmax + cout] = w_np[dy, dx]
        sc = np.zeros((Cmax,), np.float32)
        bs = np.zeros((Cmax,), np.float32)
        sc[:cout] = np.asarray(scale, np.float32)
        bs[:cout] = np.asarray(bias, np.float32)
        s_big[l, 0] = np.tile(sc, W)
        b_big[l, 0] = np.tile(bs, W)
    return jnp.asarray(w_big), jnp.asarray(s_big), jnp.asarray(b_big)


# ------------------------------ JAX reference -------------------------------

def segnet_enc_reference_nchw(x_nchw, layer_params):
    """Pure-JAX reference (lax.conv) for correctness checking."""
    x = jnp.transpose(x_nchw, (0, 2, 3, 1))
    for (w, s, b) in layer_params:
        y = jax.lax.conv_general_dilated(
            x, w, window_strides=(1, 1), padding="SAME",
            dimension_numbers=("NHWC", "HWIO", "NHWC"),
            precision=jax.lax.Precision.HIGHEST)
        x = jnp.maximum(y * s + b, 0.0)
    return jnp.transpose(x, (0, 3, 1, 2))


# ----------------------------------- main -----------------------------------

if __name__ == "__main__":
    key = jax.random.PRNGKey(0)
    k_x, k_p = jax.random.split(key)

    # Small shapes consistent with the module: SegNetEnc(in=4, out=8, num_layers=1)
    N, C_in, H, W = 2, 4, 16, 16
    C_out, num_layers = 8, 1

    x = jax.random.normal(k_x, (N, C_in, H, W), jnp.float32)  # NCHW like PyTorch
    params = make_segnet_enc_params(k_p, C_in, C_out, num_layers)
    w_big, s_big, b_big = expand_segnet_params(params, W)

    out = segnet_enc_forward_nchw(x, w_big, s_big, b_big, out_channels=C_out)
    out = jax.block_until_ready(out)

    ref = segnet_enc_reference_nchw(x, params)

    assert out.shape == (N, C_out, H, W), out.shape
    assert out.dtype == jnp.float32
    max_err = float(jnp.max(jnp.abs(out - ref)))
    assert jnp.allclose(out, ref, atol=5e-4, rtol=5e-4), max_err

    print("KERNEL_OK")
</pallas_src>

<mosaic_0001>
module attributes {stable_mosaic.version = 11 : i64} {
  func.func @_segnet_enc_kernel(%arg0: i32, %arg1: memref<1x16x128xf32, #tpu.memory_space<vmem>>, %arg2: memref<3x3x144x128xf32, #tpu.memory_space<vmem>>, %arg3: memref<3x1x128xf32, #tpu.memory_space<vmem>>, %arg4: memref<3x1x128xf32, #tpu.memory_space<vmem>>, %arg5: memref<1x16x128xf32, #tpu.memory_space<vmem>>, %arg6: memref<18x144xf32, #tpu.memory_space<vmem>>) attributes {dimension_semantics = [#tpu.dimension_semantics<parallel>], iteration_bounds = array<i64: 2>, scalar_prefetch = 0 : i64, scratch_operands = 1 : i64, tpu.core_type = #tpu.core_type<tc>, window_params = [{transform_indices = @transform_0, window_bounds = array<i64: 1, 16, 128>}, {pipeline_mode = #tpu.pipeline_mode<synchronous>, transform_indices = @transform_1, window_bounds = array<i64: 3, 3, 144, 128>}, {pipeline_mode = #tpu.pipeline_mode<synchronous>, transform_indices = @transform_2, window_bounds = array<i64: 3, 1, 128>}, {pipeline_mode = #tpu.pipeline_mode<synchronous>, transform_indices = @transform_3, window_bounds = array<i64: 3, 1, 128>}, {transform_indices = @transform_4, window_bounds = array<i64: 1, 16, 128>}]} {
    %cst = arith.constant 0.000000e+00 : f32
    %0 = vector.broadcast %cst : f32 to vector<16x8xf32>
    %cst_0 = arith.constant 0.000000e+00 : f32
    %1 = vector.broadcast %cst_0 : f32 to vector<18x144xf32>
    %c0 = arith.constant 0 : index
    %c0_1 = arith.constant 0 : index
    %2 = vector.load %arg6[%c0, %c0_1] : memref<18x144xf32, #tpu.memory_space<vmem>>, vector<18x144xf32>
    tpu.vector_store %arg6[%c0, %c0_1], %1 {strides = array<i32>} : memref<18x144xf32, #tpu.memory_space<vmem>>, vector<18x144xf32>,
    %c0_2 = arith.constant 0 : index
    %c0_3 = arith.constant 0 : index
    %c0_4 = arith.constant 0 : index
    %3 = vector.load %arg1[%c0_2, %c0_3, %c0_4] : memref<1x16x128xf32, #tpu.memory_space<vmem>>, vector<1x16x128xf32>
    %4 = vector.shape_cast %3 : vector<1x16x128xf32> to vector<16x128xf32>
    %5 = tpu.concatenate %0, %4, %0 in 1 : vector<16x8xf32>, vector<16x128xf32>, vector<16x8xf32> -> vector<16x144xf32>
    %c1 = arith.constant 1 : index
    %c0_5 = arith.constant 0 : index
    %6 = vector.load %arg6[%c1, %c0_5] : memref<18x144xf32, #tpu.memory_space<vmem>>, vector<16x144xf32>
    tpu.vector_store %arg6[%c1, %c0_5], %5 {strides = array<i32>} : memref<18x144xf32, #tpu.memory_space<vmem>>, vector<16x144xf32>,
    %cst_6 = arith.constant 0.000000e+00 : f32
    %7 = vector.broadcast %cst_6 : f32 to vector<16x128xf32>
    %c0_7 = arith.constant 0 : index
    %c0_8 = arith.constant 0 : index
    %8 = vector.load %arg6[%c0_7, %c0_8] : memref<18x144xf32, #tpu.memory_space<vmem>>, vector<16x144xf32>
    %c0_9 = arith.constant 0 : index
    %c0_10 = arith.constant 0 : index
    %c0_11 = arith.constant 0 : index
    %c0_12 = arith.constant 0 : index
    %9 = vector.load %arg2[%c0_9, %c0_10, %c0_11, %c0_12] : memref<3x3x144x128xf32, #tpu.memory_space<vmem>>, vector<1x1x144x128xf32>
    %10 = vector.shape_cast %9 : vector<1x1x144x128xf32> to vector<144x128xf32>
    %cst_13 = arith.constant dense<0.000000e+00> : vector<16x128xf32>
    %11 = tpu.matmul %8, %10, %cst_13 {dimension_numbers = #tpu.dot_dimension_numbers<[1], [0], [0], [1], [0, 0, 1, 1], [], []>} : vector<16x144xf32>, vector<144x128xf32>, vector<16x128xf32> -> vector<16x128xf32>
    %12 = arith.addf %7, %11 : vector<16x128xf32>
    %c1_14 = arith.constant 1 : index
    %c0_15 = arith.constant 0 : index
    %13 = vector.load %arg6[%c1_14, %c0_15] : memref<18x144xf32, #tpu.memory_space<vmem>>, vector<16x144xf32>
    %c0_16 = arith.constant 0 : index
    %c1_17 = arith.constant 1 : index
    %c0_18 = arith.constant 0 : index
    %c0_19 = arith.constant 0 : index
    %14 = vector.load %arg2[%c0_16, %c1_17, %c0_18, %c0_19] : memref<3x3x144x128xf32, #tpu.memory_space<vmem>>, vector<1x1x144x128xf32>
    %15 = vector.shape_cast %14 : vector<1x1x144x128xf32> to vector<144x128xf32>
    %cst_20 = arith.constant dense<0.000000e+00> : vector<16x128xf32>
    %16 = tpu.matmul %13, %15, %cst_20 {dimension_numbers = #tpu.dot_dimension_numbers<[1], [0], [0], [1], [0, 0, 1, 1], [], []>} : vector<16x144xf32>, vector<144x128xf32>, vector<16x128xf32> -> vector<16x128xf32>
    %17 = arith.addf %12, %16 : vector<16x128xf32>
    %c2 = arith.constant 2 : index
    %c0_21 = arith.constant 0 : index
    %18 = vector.load %arg6[%c2, %c0_21] : memref<18x144xf32, #tpu.memory_space<vmem>>, vector<16x144xf32>
    %c0_22 = arith.constant 0 : index
    %c2_23 = arith.constant 2 : index
    %c0_24 = arith.constant 0 : index
    %c0_25 = arith.constant 0 : index
    %19 = vector.load %arg2[%c0_22, %c2_23, %c0_24, %c0_25] : memref<3x3x144x128xf32, #tpu.memory_space<vmem>>, vector<1x1x144x128xf32>
    %20 = vector.shape_cast %19 : vector<1x1x144x128xf32> to vector<144x128xf32>
    %cst_26 = arith.constant dense<0.000000e+00> : vector<16x128xf32>
    %21 = tpu.matmul %18, %20, %cst_26 {dimension_numbers = #tpu.dot_dimension_numbers<[1], [0], [0], [1], [0, 0, 1, 1], [], []>} : vector<16x144xf32>, vector<144x128xf32>, vector<16x128xf32> -> vector<16x128xf32>
    %22 = arith.addf %17, %21 : vector<16x128xf32>
    %c0_27 = arith.constant 0 : index
    %c0_28 = arith.constant 0 : index
    %c0_29 = arith.constant 0 : index
    %23 = vector.load %arg3[%c0_27, %c0_28, %c0_29] : memref<3x1x128xf32, #tpu.memory_space<vmem>>, vector<1x1x128xf32>
    %24 = vector.shape_cast %23 : vector<1x1x128xf32> to vector<1x128xf32>
    %25 = vector.broadcast %24 : vector<1x128xf32> to vector<16x128xf32>
    %26 = arith.mulf %22, %25 : vector<16x128xf32>
    %c0_30 = arith.constant 0 : index
    %c0_31 = arith.constant 0 : index
    %c0_32 = arith.constant 0 : index
    %27 = vector.load %arg4[%c0_30, %c0_31, %c0_32] : memref<3x1x128xf32, #tpu.memory_space<vmem>>, vector<1x1x128xf32>
    %28 = vector.shape_cast %27 : vector<1x1x128xf32> to vector<1x128xf32>
    %29 = vector.broadcast %28 : vector<1x128xf32> to vector<16x128xf32>
    %30 = arith.addf %26, %29 : vector<16x128xf32>
    %cst_33 = arith.constant 0.000000e+00 : f32
    %31 = vector.broadcast %cst_33 : f32 to vector<16x128xf32>
    %32 = arith.maximumf %30, %31 : vector<16x128xf32>
    %33 = tpu.concatenate %0, %32, %0 in 1 : vector<16x8xf32>, vector<16x128xf32>, vector<16x8xf32> -> vector<16x144xf32>
    %c1_34 = arith.constant 1 : index
    %c0_35 = arith.constant 0 : index
    %34 = vector.load %arg6[%c1_34, %c0_35] : memref<18x144xf32, #tpu.memory_space<vmem>>, vector<16x144xf32>
    tpu.vector_store %arg6[%c1_34, %c0_35], %33 {strides = array<i32>} : memref<18x144xf32, #tpu.memory_space<vmem>>, vector<16x144xf32>,
    %cst_36 = arith.constant 0.000000e+00 : f32
    %35 = vector.broadcast %cst_36 : f32 to vector<16x128xf32>
    %c0_37 = arith.constant 0 : index
    %c0_38 = arith.constant 0 : index
    %36 = vector.load %arg6[%c0_37, %c0_38] : memref<18x144xf32, #tpu.memory_space<vmem>>, vector<16x144xf32>
    %c1_39 = arith.constant 1 : index
    %c0_40 = arith.constant 0 : index
    %c0_41 = arith.constant 0 : index
    %c0_42 = arith.constant 0 : index
    %37 = vector.load %arg2[%c1_39, %c0_40, %c0_41, %c0_42] : memref<3x3x144x128xf32, #tpu.memory_space<vmem>>, vector<1x1x144x128xf32>
    %38 = vector.shape_cast %37 : vector<1x1x144x128xf32> to vector<144x128xf32>
    %cst_43 = arith.constant dense<0.000000e+00> : vector<16x128xf32>
    %39 = tpu.matmul %36, %38, %cst_43 {dimension_numbers = #tpu.dot_dimension_numbers<[1], [0], [0], [1], [0, 0, 1, 1], [], []>} : vector<16x144xf32>, vector<144x128xf32>, vector<16x128xf32> -> vector<16x128xf32>
    %40 = arith.addf %35, %39 : vector<16x128xf32>
    %c1_44 = arith.constant 1 : index
    %c0_45 = arith.constant 0 : index
    %41 = vector.load %arg6[%c1_44, %c0_45] : memref<18x144xf32, #tpu.memory_space<vmem>>, vector<16x144xf32>
    %c1_46 = arith.constant 1 : index
    %c1_47 = arith.constant 1 : index
    %c0_48 = arith.constant 0 : index
    %c0_49 = arith.constant 0 : index
    %42 = vector.load %arg2[%c1_46, %c1_47, %c0_48, %c0_49] : memref<3x3x144x128xf32, #tpu.memory_space<vmem>>, vector<1x1x144x128xf32>
    %43 = vector.shape_cast %42 : vector<1x1x144x128xf32> to vector<144x128xf32>
    %cst_50 = arith.constant dense<0.000000e+00> : vector<16x128xf32>
    %44 = tpu.matmul %41, %43, %cst_50 {dimension_numbers = #tpu.dot_dimension_numbers<[1], [0], [0], [1], [0, 0, 1, 1], [], []>} : vector<16x144xf32>, vector<144x128xf32>, vector<16x128xf32> -> vector<16x128xf32>
    %45 = arith.addf %40, %44 : vector<16x128xf32>
    %c2_51 = arith.constant 2 : index
    %c0_52 = arith.constant 0 : index
    %46 = vector.load %arg6[%c2_51, %c0_52] : memref<18x144xf32, #tpu.memory_space<vmem>>, vector<16x144xf32>
    %c1_53 = arith.constant 1 : index
    %c2_54 = arith.constant 2 : index
    %c0_55 = arith.constant 0 : index
    %c0_56 = arith.constant 0 : index
    %47 = vector.load %arg2[%c1_53, %c2_54, %c0_55, %c0_56] : memref<3x3x144x128xf32, #tpu.memory_space<vmem>>, vector<1x1x144x128xf32>
    %48 = vector.shape_cast %47 : vector<1x1x144x128xf32> to vector<144x128xf32>
    %cst_57 = arith.constant dense<0.000000e+00> : vector<16x128xf32>
    %49 = tpu.matmul %46, %48, %cst_57 {dimension_numbers = #tpu.dot_dimension_numbers<[1], [0], [0], [1], [0, 0, 1, 1], [], []>} : vector<16x144xf32>, vector<144x128xf32>, vector<16x128xf32> -> vector<16x128xf32>
    %50 = arith.addf %45, %49 : vector<16x128xf32>
    %c1_58 = arith.constant 1 : index
    %c0_59 = arith.constant 0 : index
    %c0_60 = arith.constant 0 : index
    %51 = vector.load %arg3[%c1_58, %c0_59, %c0_60] : memref<3x1x128xf32, #tpu.memory_space<vmem>>, vector<1x1x128xf32>
    %52 = vector.shape_cast %51 : vector<1x1x128xf32> to vector<1x128xf32>
    %53 = vector.broadcast %52 : vector<1x128xf32> to vector<16x128xf32>
    %54 = arith.mulf %50, %53 : vector<16x128xf32>
    %c1_61 = arith.constant 1 : index
    %c0_62 = arith.constant 0 : index
    %c0_63 = arith.constant 0 : index
    %55 = vector.load %arg4[%c1_61, %c0_62, %c0_63] : memref<3x1x128xf32, #tpu.memory_space<vmem>>, vector<1x1x128xf32>
    %56 = vector.shape_cast %55 : vector<1x1x128xf32> to vector<1x128xf32>
    %57 = vector.broadcast %56 : vector<1x128xf32> to vector<16x128xf32>
    %58 = arith.addf %54, %57 : vector<16x128xf32>
    %cst_64 = arith.constant 0.000000e+00 : f32
    %59 = vector.broadcast %cst_64 : f32 to vector<16x128xf32>
    %60 = arith.maximumf %58, %59 : vector<16x128xf32>
    %61 = tpu.concatenate %0, %60, %0 in 1 : vector<16x8xf32>, vector<16x128xf32>, vector<16x8xf32> -> vector<16x144xf32>
    %c1_65 = arith.constant 1 : index
    %c0_66 = arith.constant 0 : index
    %62 = vector.load %arg6[%c1_65, %c0_66] : memref<18x144xf32, #tpu.memory_space<vmem>>, vector<16x144xf32>
    tpu.vector_store %arg6[%c1_65, %c0_66], %61 {strides = array<i32>} : memref<18x144xf32, #tpu.memory_space<vmem>>, vector<16x144xf32>,
    %cst_67 = arith.constant 0.000000e+00 : f32
    %63 = vector.broadcast %cst_67 : f32 to vector<16x128xf32>
    %c0_68 = arith.constant 0 : index
    %c0_69 = arith.constant 0 : index
    %64 = vector.load %arg6[%c0_68, %c0_69] : memref<18x144xf32, #tpu.memory_space<vmem>>, vector<16x144xf32>
    %c2_70 = arith.constant 2 : index
    %c0_71 = arith.constant 0 : index
    %c0_72 = arith.constant 0 : index
    %c0_73 = arith.constant 0 : index
    %65 = vector.load %arg2[%c2_70, %c0_71, %c0_72, %c0_73] : memref<3x3x144x128xf32, #tpu.memory_space<vmem>>, vector<1x1x144x128xf32>
    %66 = vector.shape_cast %65 : vector<1x1x144x128xf32> to vector<144x128xf32>
    %cst_74 = arith.constant dense<0.000000e+00> : vector<16x128xf32>
    %67 = tpu.matmul %64, %66, %cst_74 {dimension_numbers = #tpu.dot_dimension_numbers<[1], [0], [0], [1], [0, 0, 1, 1], [], []>} : vector<16x144xf32>, vector<144x128xf32>, vector<16x128xf32> -> vector<16x128xf32>
    %68 = arith.addf %63, %67 : vector<16x128xf32>
    %c1_75 = arith.constant 1 : index
    %c0_76 = arith.constant 0 : index
    %69 = vector.load %arg6[%c1_75, %c0_76] : memref<18x144xf32, #tpu.memory_space<vmem>>, vector<16x144xf32>
    %c2_77 = arith.constant 2 : index
    %c1_78 = arith.constant 1 : index
    %c0_79 = arith.constant 0 : index
    %c0_80 = arith.constant 0 : index
    %70 = vector.load %arg2[%c2_77, %c1_78, %c0_79, %c0_80] : memref<3x3x144x128xf32, #tpu.memory_space<vmem>>, vector<1x1x144x128xf32>
    %71 = vector.shape_cast %70 : vector<1x1x144x128xf32> to vector<144x128xf32>
    %cst_81 = arith.constant dense<0.000000e+00> : vector<16x128xf32>
    %72 = tpu.matmul %69, %71, %cst_81 {dimension_numbers = #tpu.dot_dimension_numbers<[1], [0], [0], [1], [0, 0, 1, 1], [], []>} : vector<16x144xf32>, vector<144x128xf32>, vector<16x128xf32> -> vector<16x128xf32>
    %73 = arith.addf %68, %72 : vector<16x128xf32>
    %c2_82 = arith.constant 2 : index
    %c0_83 = arith.constant 0 : index
    %74 = vector.load %arg6[%c2_82, %c0_83] : memref<18x144xf32, #tpu.memory_space<vmem>>, vector<16x144xf32>
    %c2_84 = arith.constant 2 : index
    %c2_85 = arith.constant 2 : index
    %c0_86 = arith.constant 0 : index
    %c0_87 = arith.constant 0 : index
    %75 = vector.load %arg2[%c2_84, %c2_85, %c0_86, %c0_87] : memref<3x3x144x128xf32, #tpu.memory_space<vmem>>, vector<1x1x144x128xf32>
    %76 = vector.shape_cast %75 : vector<1x1x144x128xf32> to vector<144x128xf32>
    %cst_88 = arith.constant dense<0.000000e+00> : vector<16x128xf32>
    %77 = tpu.matmul %74, %76, %cst_88 {dimension_numbers = #tpu.dot_dimension_numbers<[1], [0], [0], [1], [0, 0, 1, 1], [], []>} : vector<16x144xf32>, vector<144x128xf32>, vector<16x128xf32> -> vector<16x128xf32>
    %78 = arith.addf %73, %77 : vector<16x128xf32>
    %c2_89 = arith.constant 2 : index
    %c0_90 = arith.constant 0 : index
    %c0_91 = arith.constant 0 : index
    %79 = vector.load %arg3[%c2_89, %c0_90, %c0_91] : memref<3x1x128xf32, #tpu.memory_space<vmem>>, vector<1x1x128xf32>
    %80 = vector.shape_cast %79 : vector<1x1x128xf32> to vector<1x128xf32>
    %81 = vector.broadcast %80 : vector<1x128xf32> to vector<16x128xf32>
    %82 = arith.mulf %78, %81 : vector<16x128xf32>
    %c2_92 = arith.constant 2 : index
    %c0_93 = arith.constant 0 : index
    %c0_94 = arith.constant 0 : index
    %83 = vector.load %arg4[%c2_92, %c0_93, %c0_94] : memref<3x1x128xf32, #tpu.memory_space<vmem>>, vector<1x1x128xf32>
    %84 = vector.shape_cast %83 : vector<1x1x128xf32> to vector<1x128xf32>
    %85 = vector.broadcast %84 : vector<1x128xf32> to vector<16x128xf32>
    %86 = arith.addf %82, %85 : vector<16x128xf32>
    %cst_95 = arith.constant 0.000000e+00 : f32
    %87 = vector.broadcast %cst_95 : f32 to vector<16x128xf32>
    %88 = arith.maximumf %86, %87 : vector<16x128xf32>
    %c0_96 = arith.constant 0 : index
    %c0_97 = arith.constant 0 : index
    %c0_98 = arith.constant 0 : index
    %89 = vector.load %arg5[%c0_96, %c0_97, %c0_98] : memref<1x16x128xf32, #tpu.memory_space<vmem>>, vector<1x16x128xf32>
    %90 = vector.shape_cast %89 : vector<1x16x128xf32> to vector<16x128xf32>
    %91 = vector.shape_cast %88 : vector<16x128xf32> to vector<1x16x128xf32>
    tpu.vector_store %arg5[%c0_96, %c0_97, %c0_98], %91 {strides = array<i32>} : memref<1x16x128xf32, #tpu.memory_space<vmem>>, vector<1x16x128xf32>,
    return
  }
  func.func @transform_0(%arg0: i32) -> (i32, i32, i32) {
    %c0_i32 = arith.constant 0 : i32
    %c0_i32_0 = arith.constant 0 : i32
    %c0_i32_1 = arith.constant 0 : i32
    return %arg0, %c0_i32, %c0_i32_0 : i32, i32, i32
  }
  func.func @transform_1(%arg0: i32) -> (i32, i32, i32, i32) {
    %c0_i32 = arith.constant 0 : i32
    %c0_i32_0 = arith.constant 0 : i32
    %c0_i32_1 = arith.constant 0 : i32
    %c0_i32_2 = arith.constant 0 : i32
    %c0_i32_3 = arith.constant 0 : i32
    return %c0_i32, %c0_i32_0, %c0_i32_1, %c0_i32_2 : i32, i32, i32, i32
  }
  func.func @transform_2(%arg0: i32) -> (i32, i32, i32) {
    %c0_i32 = arith.constant 0 : i32
    %c0_i32_0 = arith.constant 0 : i32
    %c0_i32_1 = arith.constant 0 : i32
    %c0_i32_2 = arith.constant 0 : i32
    return %c0_i32, %c0_i32_0, %c0_i32_1 : i32, i32, i32
  }
  func.func @transform_3(%arg0: i32) -> (i32, i32, i32) {
    %c0_i32 = arith.constant 0 : i32
    %c0_i32_0 = arith.constant 0 : i32
    %c0_i32_1 = arith.constant 0 : i32
    %c0_i32_2 = arith.constant 0 : i32
    return %c0_i32, %c0_i32_0, %c0_i32_1 : i32, i32, i32
  }
  func.func @transform_4(%arg0: i32) -> (i32, i32, i32) {
    %c0_i32 = arith.constant 0 : i32
    %c0_i32_0 = arith.constant 0 : i32
    %c0_i32_1 = arith.constant 0 : i32
    return %arg0, %c0_i32, %c0_i32_0 : i32, i32, i32
  }
}

</mosaic_0001>

<bundles_post_ra>
// kernel: segnet_enc_forward_nchw.1
= control target key start
LH: loop header
LB: loop body
LE: loop exit
PB: predicated region body
PF: predicated region fallthrough
CT: control target
= control target key end

     0   :  { %9 = vsyncpa [#allocation4], 0  ;;  %s1662_s15 = smov 0   ;;  %s2021_s0 = inlined_call_operand.vmem [shape: f32[2,16,128], index: 0, kind: input, shape index: {}]   ;;  %s2022_s1 = inlined_call_operand.hbm [shape: f32[3,3,144,128], index: 1, kind: input, shape index: {}]   ;;  %s2023_s2 = inlined_call_operand.vmem [shape: f32[3,1,128], index: 2, kind: input, shape index: {}]   ;;  %s2024_s3 = inlined_call_operand.vmem [shape: f32[3,1,128], index: 3, kind: input, shape index: {}]   ;;  %s2025_s4 = inlined_call_operand.vmem [shape: f32[2,16,128], index: 4, kind: output, shape index: {}]  }
   0x1 LB: > { %s1668_s16 = sadd.s32 4294967295, %s1630_s15   ;;  %p1494_p0 = scmp.ge.s32.totalorder %s1630_s15, 1  ;;  %s1630_s15 = sphi %s1662_s15, %s15_s15  }
   0x2   : > { %p135_p1 = scmp.lt.s32.totalorder %s1630_s15, 3  ;;  %s1632_s17 = smov [#allocation3]  }
   0x3   : > { %s147_s18 = sshll.u32 %s1632_s17, 4  ;;  %p1579_p3 = scmp.eq.s32.totalorder %s1668_s16, 0  ;;  %s148_s18 = int_to_ptr.vmem [resolvable:$true] %s147_s18 }
   0x4   : > { %p1672_p2 = pnand %p1494_p0, %p135_p1  ;;  %s1605_s20 = scalar_lea.vmem %s148_s18, 20736 }
   0x5   : > { %p1606_p7 = scmp.ne.s32.totalorder %s148_s18, %s1605_s20  ;;  %p1613_p10 = scmp.lt.s32.totalorder %s148_s18, %s148_s18 }
   0x6   : > { %p1575_p4 = pneg %p1672_p2  ;;  %p1614_p11 = scmp.lt.s32.totalorder %s1605_s20, %s1605_s20 }
   0x8   : > { %p1576_p5 = pnand %p1579_p3, %p1575_p4  ;;  %p1615_p12 = por %p1614_p11, %p1613_p10 }
   0xa   : > { %p1596_p6 = pneg %p1576_p5 }
   0xc   : > { %p1608_p8 = pnand %p1606_p7, %p1596_p6 }
   0xe   : > { %p1609_p9 = pneg %p1608_p8 }
  0x10   : > { %p1616_p13 = pnand %p1615_p12, %p1609_p9 }
  0x12   : > { %1619 = shalt.err (!%p1616_p13)
}
  0x13   : > { %s1633_s21 = smov 128   ;;  %s1634_s22 = smov 8  }
  0x14   : > { %1578 = dma.hbm_to_vmem [thread:$0]  (!%p1576_p5), %s2022_s1, 20736, %s148_s18, [#allocation4], %s1633_s21, %s1633_s21, %s1634_s22  }
  0x15   : > { %177 = sbr.rel (%p1672_p2) target bundleno = 1152 (0x480), region = 36 }
  0x1a   : > { %1625 = dma.done.wait (%p1579_p3), [#allocation4], 20736  }
  0x1b   : > { %1627 = vsyncadd (%p1579_p3), [#allocation4], 4294946560  ;;  %p203_p0 = scmp.lt.s32.totalorder %s1668_s16, 1  ;;  %vm214_vm0 = vcmask 130048   ;;  %v1635_v0 = vmov 0.0   ;;  %vm219_vm1 = vcmask 123904  }
  0x1c   : > { %409 = vmatprep.subr.mxu1 %v1635_v0  ;;  %213 = vst [vmem:[#allocation2] sm:$0xff] %v1635_v0  ;;  %218 = vst [vmem:[#allocation2 + $0x20] sm:$0x3] %v1635_v0  ;;  %329 = vmatprep.subr.mxu0 %v1635_v0  ;;  %v280_v2 = vld [vmem:[#allocation3 + $0x78] sm:$0xff]  ;;  %s1636_s29 = smov 8   ;;  %v279_v3 = vld [vmem:[#allocation3 + $0x70] sm:$0xff] }
  0x1d   : > { %215 = vst.msk [vmem:[#allocation2 + $0x8] sm:$0xff] %vm214_vm0, %v1635_v0  ;;  %217 = vst.msk [vmem:[#allocation2 + $0x18] sm:$0xff] %vm214_vm0, %v1635_v0  ;;  %s2028_s16 = smov (!%p203_p0, %s1668_s16), 1  ;;  %410 = vmatpush1.msra.mxu1 %v280_v2  ;;  %v278_v5 = vld [vmem:[#allocation3 + $0x68] sm:$0xff]  ;;  %v302_v7 = vld [vmem:[#allocation3 + $0x100] sm:$0xff]  ;;  %vm231_vm2 = vcmask 64512  }
  0x1e   : > { %220 = vst.msk [vmem:[#allocation2 + $0x28] sm:$0x3] %vm219_vm1, %v1635_v0  ;;  %s1533_s25 = sshll.u32 %s2028_s16, 4  ;;  %411 = vmatprep.subr.mxu1 %v1635_v0  ;;  %v303_v6 = vld [vmem:[#allocation3 + $0x108] sm:$0xff]  ;;  %v277_v8 = vld [vmem:[#allocation3 + $0x60] sm:$0xff]  ;;  %v301_v9 = vld [vmem:[#allocation3 + $0xf8] sm:$0xff] }
  0x1f   : > { %s207_s28 = scalar_lea.vmem %s2021_s0, %s1533_s25  ;;  %412 = vmatpush1.msra.mxu1 %v279_v3  ;;  %330 = vmatpush1.msra.mxu0 %v303_v6  ;;  %v276_v10 = vld [vmem:[#allocation3 + $0x58] sm:$0xff]  ;;  %v300_v11 = vld [vmem:[#allocation3 + $0xf0] sm:$0xff]  ;;  %v299_v13 = vld [vmem:[#allocation3 + $0xe8] sm:$0xff]  ;;  %vm254_vm3 = vcmask 130049   ;;  %vm240_vm4 = vcmask 1040384   ;;  %vm259_vm5 = vcmask 122880   ;;  %s212_s20 = scalar_lea.vmem %s2025_s4, %s1533_s25 }
  0x20   : > { %v221_v1 = vld [vmem:[%s207_s28] sm:$0xff]  ;;  %v222_v4 = vld [vmem:[%s207_s28 + $0x8] sm:$0xff]  ;;  %413 = vmatprep.subr.mxu1 %v1635_v0  ;;  %331 = vmatprep.subr.mxu0 %v1635_v0  ;;  %v274_v14 = vld [vmem:[#allocation3 + $0x48] sm:$0xff]  ;;  %vm312_vm6 = vcmask 1046528   ;;  %vm511_vm7 = vcmask 1045504  }
  0x21   : > { %225 = vrot.lane.b32.xlu0 %v221_v1, %s1636_s29  ;;  %414 = vmatpush1.msra.mxu1 %v278_v5  ;;  %v275_v12 = vld [vmem:[#allocation3 + $0x50] sm:$0xff]  ;;  %v298_v15 = vld [vmem:[#allocation3 + $0xe0] sm:$0xff]  ;;  %v297_v17 = vld [vmem:[#allocation3 + $0xd8] sm:$0xff] }
  0x22   : > { %415 = vmatprep.subr.mxu1 %v1635_v0  ;;  %332 = vmatpush1.msra.mxu0 %v302_v7  ;;  %v273_v16 = vld [vmem:[#allocation3 + $0x40] sm:$0xff]  ;;  %v272_v18 = vld [vmem:[#allocation3 + $0x38] sm:$0xff]  ;;  %v296_v19 = vld [vmem:[#allocation3 + $0xd0] sm:$0xff] }
  0x23   : > { %416 = vmatpush1.msra.mxu1 %v277_v8  ;;  %333 = vmatprep.subr.mxu0 %v1635_v0  ;;  %v271_v20 = vld [vmem:[#allocation3 + $0x30] sm:$0xff]  ;;  %v295_v21 = vld [vmem:[#allocation3 + $0xc8] sm:$0xff]  ;;  %v294_v23 = vld [vmem:[#allocation3 + $0xc0] sm:$0xff] }
  0x24   : > { %417 = vmatprep.subr.mxu1 %v1635_v0  ;;  %334 = vmatpush1.msra.mxu0 %v301_v9  ;;  %v270_v22 = vld [vmem:[#allocation3 + $0x28] sm:$0xff]  ;;  %v269_v24 = vld [vmem:[#allocation3 + $0x20] sm:$0xff]  ;;  %v293_v25 = vld [vmem:[#allocation3 + $0xb8] sm:$0xff] }
  0x25   : > { %227 = vrot.lane.b32.xlu0 %v222_v4, %s1636_s29  ;;  %418 = vmatpush1.msra.mxu1 %v276_v10  ;;  %v268_v26 = vld [vmem:[#allocation3 + $0x18] sm:$0xff]  ;;  %v292_v27 = vld [vmem:[#allocation3 + $0xb0] sm:$0xff]  ;;  %v291_v29 = vld [vmem:[#allocation3 + $0xa8] sm:$0xff] }
  0x26   : > { %335 = vmatprep.subr.mxu0 %v1635_v0  ;;  %419 = vmatprep.subr.mxu1 %v1635_v0  ;;  %v267_v28 = vld [vmem:[#allocation3 + $0x10] sm:$0xff]  ;;  %v266_v30 = vld [vmem:[#allocation3 + $0x8] sm:$0xff]  ;;  %v290_v31 = vld [vmem:[#allocation3 + $0xa0] sm:$0xff] }
  0x27   : > { %336 = vmatpush1.msra.mxu0 %v300_v11  ;;  %420 = vmatpush1.msra.mxu1 %v275_v12  ;;  %v265_v32 = vld [vmem:[#allocation3] sm:$0xff]  ;;  %v289_v33 = vld [vmem:[#allocation3 + $0x98] sm:$0xff]  ;;  %v282_v34 = vld [vmem:[#allocation3 + $0x88] sm:$0xff] }
  0x28   : > { %337 = vmatprep.subr.mxu0 %v1635_v0  ;;  %421 = vmatprep.subr.mxu1 %v1635_v0  ;;  %v288_v35 = vld [vmem:[#allocation3 + $0x90] sm:$0xff]  ;;  %v281_v36 = vld [vmem:[#allocation3 + $0x80] sm:$0xff]  ;;  %v305_v37 = vld [vmem:[#allocation3 + $0x118] sm:$0xff] }
  0x29   : > { %338 = vmatpush1.msra.mxu0 %v299_v13  ;;  %422 = vmatpush1.msra.mxu1 %v274_v14  ;;  %v304_v38 = vld [vmem:[#allocation3 + $0x110] sm:$0xff]  ;;  %v504_v1 = vld [vmem:[#allocation3 + $0x198] sm:$0xff]  ;;  %v502_v8 = vld [vmem:[#allocation3 + $0x188] sm:$0xff] }
  0x2a   : > { %339 = vmatprep.subr.mxu0 %v1635_v0  ;;  %423 = vmatprep.subr.mxu1 %v1635_v0  ;;  %v503_v7 = vld [vmem:[#allocation3 + $0x190] sm:$0xff]  ;;  %v501_v12 = vld [vmem:[#allocation3 + $0x180] sm:$0xff]  ;;  %v500_v13 = vld [vmem:[#allocation3 + $0x178] sm:$0xff] }
  0x2b   : > { %340 = vmatpush1.msra.mxu0 %v298_v15  ;;  %424 = vmatpush1.msra.mxu1 %v273_v16  ;;  %v499_v14 = vld [vmem:[#allocation3 + $0x170] sm:$0xff]  ;;  %v498_v15 = vld [vmem:[#allocation3 + $0x168] sm:$0xff]  ;;  %v497_v16 = vld [vmem:[#allocation3 + $0x160] sm:$0xff] }
  0x2c   : > { %341 = vmatprep.subr.mxu0 %v1635_v0  ;;  %425 = vmatprep.subr.mxu1 %v1635_v0 }
  0x2d   : > { %342 = vmatpush1.msra.mxu0 %v297_v17  ;;  %426 = vmatpush1.msra.mxu1 %v272_v18  ;;  %v496_v17 = vld [vmem:[#allocation3 + $0x158] sm:$0xff]  ;;  %v495_v18 = vld [vmem:[#allocation3 + $0x150] sm:$0xff] }
  0x2e   : > { %343 = vmatprep.subr.mxu0 %v1635_v0  ;;  %427 = vmatprep.subr.mxu1 %v1635_v0 }
  0x2f   : > { %344 = vmatpush1.msra.mxu0 %v296_v19  ;;  %428 = vmatpush1.msra.mxu1 %v271_v20  ;;  %v494_v19 = vld [vmem:[#allocation3 + $0x148] sm:$0xff]  ;;  %v493_v20 = vld [vmem:[#allocation3 + $0x140] sm:$0xff] }
  0x30   : > { %345 = vmatprep.subr.mxu0 %v1635_v0  ;;  %429 = vmatprep.subr.mxu1 %v1635_v0 }
  0x31   : > { %346 = vmatpush1.msra.mxu0 %v295_v21  ;;  %430 = vmatpush1.msra.mxu1 %v270_v22  ;;  %v492_v21 = vld [vmem:[#allocation3 + $0x138] sm:$0xff]  ;;  %v491_v22 = vld [vmem:[#allocation3 + $0x130] sm:$0xff] }
  0x32   : > { %347 = vmatprep.subr.mxu0 %v1635_v0  ;;  %431 = vmatprep.subr.mxu1 %v1635_v0 }
  0x33   : > { %348 = vmatpush1.msra.mxu0 %v294_v23  ;;  %432 = vmatpush1.msra.mxu1 %v269_v24  ;;  %v490_v23 = vld [vmem:[#allocation3 + $0x128] sm:$0xff]  ;;  %v489_v24 = vld [vmem:[#allocation3 + $0x120] sm:$0xff] }
  0x34   : > { %349 = vmatprep.subr.mxu0 %v1635_v0  ;;  %433 = vmatprep.subr.mxu1 %v1635_v0 }
  0x35   : > { %350 = vmatpush1.msra.mxu0 %v293_v25  ;;  %434 = vmatpush1.msra.mxu1 %v268_v26 }
  0x36   : > { %351 = vmatprep.subr.mxu0 %v1635_v0  ;;  %435 = vmatprep.subr.mxu1 %v1635_v0 }
  0x37   : > { %352 = vmatpush1.msra.mxu0 %v292_v27  ;;  %436 = vmatpush1.msra.mxu1 %v267_v28  ;;  %v506_v27 = vld [vmem:[#allocation3 + $0x1a8] sm:$0xff] }
  0x38   : > { %353 = vmatprep.subr.mxu0 %v1635_v0  ;;  %437 = vmatprep.subr.mxu1 %v1635_v0 }
  0x39   : > { %354 = vmatpush1.msra.mxu0 %v291_v29  ;;  %438 = vmatpush1.msra.mxu1 %v266_v30  ;;  %v505_v29 = vld [vmem:[#allocation3 + $0x1a0] sm:$0xff] }
  0x3a   : > { %355 = vmatprep.subr.mxu0 %v1635_v0  ;;  %439 = vmatprep.subr.mxu1 %v1635_v0 }
  0x3b   : > { %356 = vmatpush1.msra.mxu0 %v290_v31  ;;  %440 = vmatpush1.msra.mxu1 %v265_v32 }
  0x3c   : > { %357 = vmatprep.subr.mxu0 %v1635_v0  ;;  %469 = vmatprep.subr.mxu1 %v1635_v0 }
  0x3d   : > { %358 = vmatpush1.msra.mxu0 %v289_v33  ;;  %470 = vmatpush2.msra.mxu1 %v282_v34 }
  0x3e   : > { %359 = vmatprep.subr.mxu0 %v1635_v0  ;;  %471 = vmatprep.subr.mxu1 %v1635_v0 }
  0x3f   : > { %360 = vmatpush1.msra.mxu0 %v288_v35  ;;  %472 = vmatpush2.msra.mxu1 %v281_v36 }
  0x40   : > { %389 = vmatprep.subr.mxu0 %v1635_v0  ;;  %727 = vmatprep.subr.mxu1 %v1635_v0 }
  0x41   : > { %390 = vmatpush2.msra.mxu0 %v305_v37  ;;  %v679_v37 = vld [vmem:[#allocation3 + $0x228] sm:$0xff] }
  0x42   : > { %391 = vmatprep.subr.mxu0 %v1635_v0 }
  0x43   : > { %392 = vmatpush2.msra.mxu0 %v304_v38  ;;  %v678_v38 = vld [vmem:[#allocation3 + $0x220] sm:$0xff] }
  0x44   : > { %528 = vmatprep.subr.mxu0 %v1635_v0 }
  0x93   : > { %v226_v39 = vpop.permute.xlu0 %225 }
  0x94   : > { %v232_v40 = vsel %vm231_vm2, 0.0, %v226_v39  ;;  %v234_v41 = vsel %vm231_vm2, %v226_v39, 0.0  ;;  %v702_v39 = vld [vmem:[#allocation3 + $0x2b8] sm:$0xff] }
  0x95   : > { %v241_v42 = vrot.slane %v232_v40, 7  ;;  %v242_v43 = vrot.slane %v234_v41, 7  ;;  %v677_v40 = vld [vmem:[#allocation3 + $0x218] sm:$0xff]  ;;  %v701_v41 = vld [vmem:[#allocation3 + $0x2b0] sm:$0xff] }
  0x97   : > { %253 = vst [vmem:[#allocation2] sm:$0xfe] %v241_v42  ;;  %255 = vst.msk [vmem:[#allocation2 + $0x8] sm:$0xfe] %vm254_vm3, %v242_v43  ;;  %v228_v44 = vpop.permute.xlu0 %227 }
  0x98   : > { %v233_v45 = vsel %vm231_vm2, 0.0, %v228_v44  ;;  %v235_v46 = vsel %vm231_vm2, %v228_v44, 0.0  ;;  %v699_v44 = vld [vmem:[#allocation3 + $0x2a0] sm:$0xff] }
  0x99   : > { %v243_v47 = vrot.slane %v233_v45, 7  ;;  %v245_v48 = vrot.slane %v235_v46, 7  ;;  %v675_v45 = vld [vmem:[#allocation3 + $0x208] sm:$0xff]  ;;  %v698_v46 = vld [vmem:[#allocation3 + $0x298] sm:$0xff] }
  0x9b   : > { %v246_v49 = vsel %vm240_vm4, %v242_v43, %v245_v48  ;;  %258 = vst [vmem:[#allocation2 + $0x20] sm:$0x1] %v243_v47  ;;  %260 = vst.msk [vmem:[#allocation2 + $0x28] sm:$0x1] %vm259_vm5, %v245_v48  ;;  %v1757_v54 = vsel %vm240_vm4, %v241_v42, %v243_v47  ;;  %v700_v42 = vld [vmem:[#allocation3 + $0x2a8] sm:$0xff]  ;;  %v676_v43 = vld [vmem:[#allocation3 + $0x210] sm:$0xff] }
  0x9c   : > { %257 = vst.msk [vmem:[#allocation2 + $0x18] sm:$0xff] %vm214_vm0, %v246_v49  ;;  %v314_v62 = vrot.slane %v1757_v54, 1  ;;  %v513_v32 = vrot.slane %v1757_v54, 2  ;;  %v674_v47 = vld [vmem:[#allocation3 + $0x200] sm:$0xff]  ;;  %v697_v48 = vld [vmem:[#allocation3 + $0x290] sm:$0xff]  ;;  %v673_v49 = vld [vmem:[#allocation3 + $0x1f8] sm:$0xff] }
  0x9e   : > { %v262_v50 = vld [vmem:[#allocation2 + $0x8] sm:$0xff]  ;;  %v261_v51 = vld [vmem:[#allocation2] sm:$0xff] }
  0x9f   : > { %1505 = vmatprep.mubr.msk.f32.mxu1 %vm214_vm0, %v262_v50  ;;  %v283_v52 = vld [vmem:[#allocation2] sm:$0xfe]  ;;  %v284_v53 = vld [vmem:[#allocation2 + $0x8] sm:$0xfe]  ;;  %v696_v50 = vld [vmem:[#allocation3 + $0x288] sm:$0xff] }
  0xa0   : > { %474 = vmatmul.mubr.f32.vlgmr.msra.gmra.mxu1 %v261_v51  ;;  %v313_v57 = vrot.slane %v283_v52, 1  ;;  %v316_v58 = vrot.slane %v284_v53, 1  ;;  %v485_v4 = vld [vmem:[#allocation2 + $0x8] sm:$0xfc]  ;;  %v484_v25 = vld [vmem:[#allocation2] sm:$0xfc] }
  0xa1   : > { %v515_v9 = vrot.slane %v485_v4, 2  ;;  %v512_v28 = vrot.slane %v484_v25, 2  ;;  %728 = vmatpush1.msra.mxu1 %v702_v39  ;;  %v672_v51 = vld [vmem:[#allocation3 + $0x1f0] sm:$0xff]  ;;  %v695_v52 = vld [vmem:[#allocation3 + $0x280] sm:$0xff]  ;;  %v671_v53 = vld [vmem:[#allocation3 + $0x1e8] sm:$0xff] }
  0xa2   : > { %v286_v55 = vld [vmem:[#allocation2 + $0x28] sm:$0x1]  ;;  %v285_v61 = vld [vmem:[#allocation2 + $0x20] sm:$0x1]  ;;  %v315_v2 = vsel %vm312_vm6, %v313_v57, %v314_v62  ;;  %729 = vmatprep.subr.mxu1 %v1635_v0 }
  0xa3   : > { %v1759_v56 = vld [vmem:[#allocation2 + $0x18] sm:$0xff]  ;;  %v321_v60 = vrot.slane %v286_v55, 1  ;;  %v319_v3 = vrot.slane %v285_v61, 1  ;;  %v487_v26 = vld [vmem:[#allocation2 + $0x28] sm:$0x3]  ;;  %v514_v33 = vsel %vm511_vm7, %v512_v28, %v513_v32  ;;  %730 = vmatpush1.msra.mxu1 %v701_v41  ;;  %v693_v4 = vld [vmem:[#allocation3 + $0x270] sm:$0xff] }
  0xa4   : > { %1506 = vmatprep.mubr.msk.f32.mxu1 %vm214_vm0, %v1759_v56  ;;  %v317_v59 = vrot.slane %v1759_v56, 1  ;;  %v516_v5 = vrot.slane %v1759_v56, 2  ;;  %v520_v30 = vrot.slane %v487_v26, 2  ;;  %v486_v31 = vld [vmem:[#allocation2 + $0x20] sm:$0x3]  ;;  %731 = vmatprep.subr.mxu1 %v1635_v0  ;;  %v669_v55 = vld [vmem:[#allocation3 + $0x1d8] sm:$0xff] }
  0xa5   : > { %479 = vmatmul.mubr.f32.gmra.mxu1 %v1757_v54  ;;  %v320_v10 = vsel %vm312_vm6, %v314_v62, %v319_v3  ;;  %v518_v34 = vrot.slane %v486_v31, 2  ;;  %v670_v54 = vld [vmem:[#allocation3 + $0x1e0] sm:$0xff]  ;;  %v668_v56 = vld [vmem:[#allocation3 + $0x1d0] sm:$0xff]  ;;  %v667_v3 = vld [vmem:[#allocation3 + $0x1c8] sm:$0xff] }
  0xa6   : > { %v318_v63 = vsel %vm312_vm6, %v316_v58, %v317_v59  ;;  %v322_v6 = vsel %vm312_vm6, %v317_v59, %v321_v60  ;;  %v517_v11 = vsel %vm511_vm7, %v515_v9, %v516_v5  ;;  %v521_v35 = vsel %vm511_vm7, %v516_v5, %v520_v30  ;;  %732 = vmatpush1.msra.mxu1 %v700_v42  ;;  %v692_v9 = vld [vmem:[#allocation3 + $0x268] sm:$0xff] }
  0xa7   : > { %1503 = vmatprep.mubr.msk.f32.mxu0 %vm214_vm0, %v318_v63  ;;  %v519_v36 = vsel %vm511_vm7, %v513_v32, %v518_v34  ;;  %733 = vmatprep.subr.mxu1 %v1635_v0  ;;  %v688_v28 = vld [vmem:[#allocation3 + $0x248] sm:$0xff] }
  0xa8   : > { %394 = vmatmul.mubr.f32.vlgmr.msra.gmra.mxu0 %v315_v2  ;;  %734 = vmatpush1.msra.mxu1 %v699_v44  ;;  %v694_v2 = vld [vmem:[#allocation3 + $0x278] sm:$0xff]  ;;  %v704_v31 = vld [vmem:[#allocation3 + $0x2c8] sm:$0xff] }
  0xa9   : > { %529 = vmatpush1.msra.mxu0 %v504_v1  ;;  %1504 = vmatprep.mubr.msk.f32.mxu0 %vm214_vm0, %v322_v6  ;;  %v666_v6 = vld [vmem:[#allocation3 + $0x1c0] sm:$0xff] }
  0xaa   : > { %530 = vmatprep.subr.mxu0 %v1635_v0  ;;  %735 = vmatprep.subr.mxu1 %v1635_v0 }
  0xab   : > { %531 = vmatpush1.msra.mxu0 %v503_v7  ;;  %736 = vmatpush1.msra.mxu1 %v698_v46 }
  0xac   : > { %532 = vmatprep.subr.mxu0 %v1635_v0  ;;  %399 = vmatmul.mubr.f32.gmra.mxu0 %v320_v10 }
  0xad   : > { %533 = vmatpush1.msra.mxu0 %v502_v8  ;;  %1507 = vmatprep.mubr.msk.f32.mxu0 %vm214_vm0, %v517_v11  ;;  %v1509_v8 = vld [vmem:[%s2023_s2] ss:$0 sm:$0xff]  ;;  %v665_v11 = vld [vmem:[#allocation3 + $0x1b8] sm:$0xff] }
  0xae   : > { %534 = vmatprep.subr.mxu0 %v1635_v0  ;;  %737 = vmatprep.subr.mxu1 %v1635_v0 }
  0xaf   : > { %535 = vmatpush1.msra.mxu0 %v501_v12  ;;  %738 = vmatpush1.msra.mxu1 %v697_v48 }
  0xb0   : > { %536 = vmatprep.subr.mxu0 %v1635_v0  ;;  %739 = vmatprep.subr.mxu1 %v1635_v0 }
  0xb1   : > { %537 = vmatpush1.msra.mxu0 %v500_v13  ;;  %740 = vmatpush1.msra.mxu1 %v696_v50  ;;  %v1510_v13 = vld [vmem:[%s2024_s3] ss:$0 sm:$0xff] }
  0xb2   : > { %538 = vmatprep.subr.mxu0 %v1635_v0  ;;  %741 = vmatprep.subr.mxu1 %v1635_v0 }
  0xb3   : > { %539 = vmatpush1.msra.mxu0 %v499_v14  ;;  %742 = vmatpush1.msra.mxu1 %v695_v52  ;;  %v691_v14 = vld [vmem:[#allocation3 + $0x260] sm:$0xff] }
  0xb4   : > { %540 = vmatprep.subr.mxu0 %v1635_v0  ;;  %743 = vmatprep.subr.mxu1 %v1635_v0 }
  0xb5   : > { %541 = vmatpush1.msra.mxu0 %v498_v15  ;;  %744 = vmatpush1.msra.mxu1 %v694_v2  ;;  %v901_v2 = vld [vmem:[#allocation3 + $0x340] sm:$0xff] }
  0xb6   : > { %542 = vmatprep.subr.mxu0 %v1635_v0  ;;  %745 = vmatprep.subr.mxu1 %v1635_v0 }
  0xb7   : > { %543 = vmatpush1.msra.mxu0 %v497_v16  ;;  %746 = vmatpush1.msra.mxu1 %v693_v4 }
  0xb8   : > { %544 = vmatprep.subr.mxu0 %v1635_v0  ;;  %747 = vmatprep.subr.mxu1 %v1635_v0 }
  0xb9   : > { %545 = vmatpush1.msra.mxu0 %v496_v17  ;;  %748 = vmatpush1.msra.mxu1 %v692_v9  ;;  %v664_v17 = vld [vmem:[#allocation3 + $0x1b0] sm:$0xff]  ;;  %v897_v9 = vld [vmem:[#allocation3 + $0x320] sm:$0xff] }
  0xba   : > { %546 = vmatprep.subr.mxu0 %v1635_v0  ;;  %749 = vmatprep.subr.mxu1 %v1635_v0 }
  0xbb   : > { %547 = vmatpush1.msra.mxu0 %v495_v18  ;;  %750 = vmatpush1.msra.mxu1 %v691_v14  ;;  %v892_v14 = vld [vmem:[#allocation3 + $0x2f8] sm:$0xff] }
  0xbc   : > { %548 = vmatprep.subr.mxu0 %v1635_v0  ;;  %751 = vmatprep.subr.mxu1 %v1635_v0 }
  0xbd   : > { %549 = vmatpush1.msra.mxu0 %v494_v19  ;;  %v690_v19 = vld [vmem:[#allocation3 + $0x258] sm:$0xff] }
  0xbe   : > { %550 = vmatprep.subr.mxu0 %v1635_v0  ;;  %752 = vmatpush1.msra.mxu1 %v690_v19  ;;  %v887_v19 = vld [vmem:[#allocation3 + $0x2d0] sm:$0xff] }
  0xbf   : > { %551 = vmatpush1.msra.mxu0 %v493_v20  ;;  %v681_v20 = vld [vmem:[#allocation3 + $0x238] sm:$0xff]  ;;  %753 = vmatprep.subr.mxu1 %v1635_v0 }
  0xc0   : > { %552 = vmatprep.subr.mxu0 %v1635_v0 }
  0xc1   : > { %553 = vmatpush1.msra.mxu0 %v492_v21  ;;  %v689_v21 = vld [vmem:[#allocation3 + $0x250] sm:$0xff] }
  0xc2   : > { %554 = vmatprep.subr.mxu0 %v1635_v0  ;;  %754 = vmatpush1.msra.mxu1 %v689_v21 }
  0xc3   : > { %555 = vmatpush1.msra.mxu0 %v491_v22  ;;  %755 = vmatprep.subr.mxu1 %v1635_v0 }
  0xc4   : > { %556 = vmatprep.subr.mxu0 %v1635_v0  ;;  %756 = vmatpush1.msra.mxu1 %v688_v28 }
  0xc5   : > { %557 = vmatpush1.msra.mxu0 %v490_v23  ;;  %757 = vmatprep.subr.mxu1 %v1635_v0 }
  0xc6   : > { %558 = vmatprep.subr.mxu0 %v1635_v0 }
  0xc7   : > { %559 = vmatpush1.msra.mxu0 %v489_v24  ;;  %v680_v24 = vld [vmem:[#allocation3 + $0x230] sm:$0xff] }
  0xc8   : > { %588 = vmatprep.subr.mxu0 %v1635_v0 }
  0xc9   : > { %589 = vmatpush2.msra.mxu0 %v506_v27 }
  0xca   : > { %590 = vmatprep.subr.mxu0 %v1635_v0 }
  0xcb   : > { %591 = vmatpush2.msra.mxu0 %v505_v29  ;;  %v687_v29 = vld [vmem:[#allocation3 + $0x240] sm:$0xff] }
  0xcc   : > { %593 = vmatmul.mubr.f32.vlgmr.msra.gmra.mxu0 %v514_v33  ;;  %807 = vmatprep.subr.mxu0 %v1635_v0  ;;  %v703_v33 = vld [vmem:[#allocation3 + $0x2c0] sm:$0xff] }
  0xcd   : > { %1508 = vmatprep.mubr.msk.f32.mxu0 %vm214_vm0, %v521_v35  ;;  %808 = vmatpush1.msra.mxu0 %v679_v37 }
  0xce   : > { %809 = vmatprep.subr.mxu0 %v1635_v0  ;;  %758 = vmatpush1.msra.mxu1 %v687_v29 }
  0xcf   : > { %810 = vmatpush1.msra.mxu0 %v678_v38  ;;  %787 = vmatprep.subr.mxu1 %v1635_v0 }
  0xd0   : > { %598 = vmatmul.mubr.f32.gmra.mxu0 %v519_v36  ;;  %811 = vmatprep.subr.mxu0 %v1635_v0 }
  0xd1   : > { %812 = vmatpush1.msra.mxu0 %v677_v40  ;;  %788 = vmatpush2.msra.mxu1 %v704_v31 }
  0xd2   : > { %813 = vmatprep.subr.mxu0 %v1635_v0  ;;  %789 = vmatprep.subr.mxu1 %v1635_v0 }
  0xd3   : > { %814 = vmatpush1.msra.mxu0 %v676_v43  ;;  %790 = vmatpush2.msra.mxu1 %v703_v33  ;;  %v1077_v33 = vld [vmem:[#allocation3 + $0x3d0] sm:$0xff] }
  0xd4   : > { %815 = vmatprep.subr.mxu0 %v1635_v0  ;;  %925 = vmatprep.subr.mxu1 %v1635_v0 }
  0xd5   : > { %816 = vmatpush1.msra.mxu0 %v675_v45 }
  0xd6   : > { %817 = vmatprep.subr.mxu0 %v1635_v0 }
  0xd7   : > { %818 = vmatpush1.msra.mxu0 %v674_v47 }
  0xd8   : > { %819 = vmatprep.subr.mxu0 %v1635_v0 }
  0xd9   : > { %820 = vmatpush1.msra.mxu0 %v673_v49 }
  0xda   : > { %821 = vmatprep.subr.mxu0 %v1635_v0 }
  0xdb   : > { %822 = vmatpush1.msra.mxu0 %v672_v51 }
  0xdc   : > { %823 = vmatprep.subr.mxu0 %v1635_v0 }
  0xdd   : > { %824 = vmatpush1.msra.mxu0 %v671_v53 }
  0xde   : > { %825 = vmatprep.subr.mxu0 %v1635_v0 }
  0xdf   : > { %826 = vmatpush1.msra.mxu0 %v670_v54 }
  0xe0   : > { %827 = vmatprep.subr.mxu0 %v1635_v0 }
  0xe1   : > { %828 = vmatpush1.msra.mxu0 %v669_v55 }
  0xe2   : > { %829 = vmatprep.subr.mxu0 %v1635_v0 }
  0xe3   : > { %830 = vmatpush1.msra.mxu0 %v668_v56 }
  0xe4   : > { %831 = vmatprep.subr.mxu0 %v1635_v0 }
  0xe5   : > { %832 = vmatpush1.msra.mxu0 %v667_v3  ;;  %v900_v3 = vld [vmem:[#allocation3 + $0x338] sm:$0xff] }
  0xe6   : > { %833 = vmatprep.subr.mxu0 %v1635_v0 }
  0xe7   : > { %834 = vmatpush1.msra.mxu0 %v666_v6 }
  0xe8   : > { %835 = vmatprep.subr.mxu0 %v1635_v0 }
  0xe9   : > { %836 = vmatpush1.msra.mxu0 %v665_v11  ;;  %v895_v11 = vld [vmem:[#allocation3 + $0x310] sm:$0xff] }
  0xea   : > { %837 = vmatprep.subr.mxu0 %v1635_v0 }
  0xeb   : > { %838 = vmatpush1.msra.mxu0 %v664_v17  ;;  %v889_v17 = vld [vmem:[#allocation3 + $0x2e0] sm:$0xff] }
  0xec   : > { %867 = vmatprep.subr.mxu0 %v1635_v0 }
  0xed   : > { %868 = vmatpush2.msra.mxu0 %v681_v20 }
  0xee   : > { %869 = vmatprep.subr.mxu0 %v1635_v0 }
  0xef   : > { %870 = vmatpush2.msra.mxu0 %v680_v24  ;;  %v903_v24 = vld [vmem:[#allocation3 + $0x350] sm:$0xff] }
  0xf0   : > { %1126 = vmatprep.subr.mxu0 %v1635_v0 }
 0x160   : > { %v475_v57 = vpop.f32.mrf.mxu1 }
 0x162   : > { %v477_v58 = vpop.f32.mrf.mxu1 }
 0x165   : > { %v480_v59 = vpop.f32.mrf.mxu1 }
 0x167   : > { %v482_v60 = vpop.f32.mrf.mxu1 }
 0x168   : > { %v395_v61 = vpop.f32.mrf.mxu0 }
 0x169   : > { %v476_v5 = vadd.f32 %v475_v57, %v395_v61 }
 0x16a   : > { %v397_v62 = vpop.f32.mrf.mxu0 }
 0x16c   : > { %v400_v63 = vpop.f32.mrf.mxu0 }
 0x16d   : > { %v481_v15 = vadd.f32 %v480_v59, %v400_v63  ;;  %v902_v59 = vld [vmem:[#allocation3 + $0x348] sm:$0xff] }
 0x16e   : > { %v402_v1 = vpop.f32.mrf.mxu0 }
 0x18c   : > { %v594_v7 = vpop.f32.mrf.mxu0 }
 0x18d   : > { %v603_v10 = vadd.f32 %v594_v7, %v476_v5  ;;  %v899_v7 = vld [vmem:[#allocation3 + $0x330] sm:$0xff] }
 0x18e   : > { %v596_v12 = vpop.f32.mrf.mxu0 }
 0x18f   : > { %v612_v16 = vmul.f32 %v1509_v8, %v603_v10  ;;  %v896_v10 = vld [vmem:[#allocation3 + $0x318] sm:$0xff]  ;;  %v894_v12 = vld [vmem:[#allocation3 + $0x308] sm:$0xff] }
 0x190   : > { %v599_v18 = vpop.f32.mrf.mxu0 }
 0x191   : > { %v604_v22 = vadd.f32 %v599_v18, %v481_v15  ;;  %v621_v23 = vadd.f32 %v1510_v13, %v612_v16  ;;  %v891_v15 = vld [vmem:[#allocation3 + $0x2f0] sm:$0xff]  ;;  %v890_v16 = vld [vmem:[#allocation3 + $0x2e8] sm:$0xff]  ;;  %v888_v18 = vld [vmem:[#allocation3 + $0x2d8] sm:$0xff] }
 0x192   : > { %v601_v25 = vpop.f32.mrf.mxu0 }
 0x193   : > { %v613_v26 = vmul.f32 %v1509_v8, %v604_v22  ;;  %v623_v27 = vmax.f32 %v621_v23, 0.0  ;;  %v898_v8 = vld [vmem:[#allocation3 + $0x328] sm:$0xff]  ;;  %v904_v22 = vld [vmem:[#allocation3 + $0x358] sm:$0xff] }
 0x195   : > { %v622_v30 = vadd.f32 %v1510_v13, %v613_v26  ;;  %627 = vrot.lane.b32.xlu1 %v623_v27, %s1636_s29  ;;  %v893_v13 = vld [vmem:[#allocation3 + $0x300] sm:$0xff] }
 0x197   : > { %v624_v32 = vmax.f32 %v622_v30, 0.0 }
 0x199   : > { %629 = vrot.lane.b32.xlu1 %v624_v32, %s1636_s29  ;;  %v1078_v32 = vld [vmem:[#allocation3 + $0x3d8] sm:$0xff] }
 0x207   : > { %v628_v34 = vpop.permute.xlu1 %627 }
 0x208   : > { %v633_v35 = vsel %vm231_vm2, 0.0, %v628_v34  ;;  %v635_v36 = vsel %vm231_vm2, %v628_v34, 0.0  ;;  %v1101_v34 = vld [vmem:[#allocation3 + $0x468] sm:$0xff] }
 0x209   : > { %v641_v37 = vrot.slane %v633_v35, 7  ;;  %v642_v38 = vrot.slane %v635_v36, 7  ;;  %v1076_v35 = vld [vmem:[#allocation3 + $0x3c8] sm:$0xff]  ;;  %v1100_v36 = vld [vmem:[#allocation3 + $0x460] sm:$0xff] }
 0x20b   : > { %653 = vst [vmem:[#allocation2] sm:$0xfe] %v641_v37  ;;  %654 = vst.msk [vmem:[#allocation2 + $0x8] sm:$0xfe] %vm254_vm3, %v642_v38  ;;  %v630_v39 = vpop.permute.xlu1 %629 }
 0x20c   : > { %v634_v40 = vsel %vm231_vm2, 0.0, %v630_v39  ;;  %v636_v41 = vsel %vm231_vm2, %v630_v39, 0.0  ;;  %v1098_v39 = vld [vmem:[#allocation3 + $0x450] sm:$0xff] }
 0x20d   : > { %v643_v42 = vrot.slane %v634_v40, 7  ;;  %v645_v43 = vrot.slane %v636_v41, 7  ;;  %v1074_v40 = vld [vmem:[#allocation3 + $0x3b8] sm:$0xff]  ;;  %v1097_v41 = vld [vmem:[#allocation3 + $0x448] sm:$0xff] }
 0x20f   : > { %v646_v44 = vsel %vm240_vm4, %v642_v38, %v645_v43  ;;  %657 = vst [vmem:[#allocation2 + $0x20] sm:$0x1] %v643_v42  ;;  %658 = vst.msk [vmem:[#allocation2 + $0x28] sm:$0x1] %vm259_vm5, %v645_v43  ;;  %v1856_v49 = vsel %vm240_vm4, %v641_v37, %v643_v42  ;;  %v1099_v37 = vld [vmem:[#allocation3 + $0x458] sm:$0xff]  ;;  %v1075_v38 = vld [vmem:[#allocation3 + $0x3c0] sm:$0xff] }
 0x210   : > { %656 = vst.msk [vmem:[#allocation2 + $0x18] sm:$0xff] %vm214_vm0, %v646_v44  ;;  %v712_v57 = vrot.slane %v1856_v49, 1  ;;  %v910_v27 = vrot.slane %v1856_v49, 2  ;;  %v1073_v42 = vld [vmem:[#allocation3 + $0x3b0] sm:$0xff]  ;;  %v1096_v43 = vld [vmem:[#allocation3 + $0x440] sm:$0xff]  ;;  %v1072_v44 = vld [vmem:[#allocation3 + $0x3a8] sm:$0xff] }
 0x212   : > { %v660_v45 = vld [vmem:[#allocation2 + $0x8] sm:$0xff]  ;;  %v659_v46 = vld [vmem:[#allocation2] sm:$0xff] }
 0x213   : > { %1513 = vmatprep.mubr.msk.f32.mxu0 %vm214_vm0, %v660_v45  ;;  %v682_v47 = vld [vmem:[#allocation2] sm:$0xfe]  ;;  %v683_v48 = vld [vmem:[#allocation2 + $0x8] sm:$0xfe] }
 0x214   : > { %872 = vmatmul.mubr.f32.vlgmr.msra.gmra.mxu0 %v659_v46  ;;  %v711_v52 = vrot.slane %v682_v47, 1  ;;  %v714_v54 = vrot.slane %v683_v48, 1  ;;  %v883_v62 = vld [vmem:[#allocation2 + $0x8] sm:$0xfc]  ;;  %v882_v20 = vld [vmem:[#allocation2] sm:$0xfc] }
 0x215   : > { %v912_v4 = vrot.slane %v883_v62, 2  ;;  %v909_v23 = vrot.slane %v882_v20, 2  ;;  %1127 = vmatpush1.msra.mxu0 %v1101_v34  ;;  %v1095_v45 = vld [vmem:[#allocation3 + $0x438] sm:$0xff]  ;;  %v1071_v46 = vld [vmem:[#allocation3 + $0x3a0] sm:$0xff]  ;;  %v1094_v47 = vld [vmem:[#allocation3 + $0x430] sm:$0xff] }
 0x216   : > { %v685_v50 = vld [vmem:[#allocation2 + $0x28] sm:$0x1]  ;;  %v684_v56 = vld [vmem:[#allocation2 + $0x20] sm:$0x1]  ;;  %v713_v60 = vsel %vm312_vm6, %v711_v52, %v712_v57  ;;  %1128 = vmatprep.subr.mxu0 %v1635_v0  ;;  %v1092_v62 = vld [vmem:[#allocation3 + $0x420] sm:$0xff] }
 0x217   : > { %v1858_v51 = vld [vmem:[#allocation2 + $0x18] sm:$0xff]  ;;  %v719_v55 = vrot.slane %v685_v50, 1  ;;  %v717_v61 = vrot.slane %v684_v56, 1  ;;  %v885_v21 = vld [vmem:[#allocation2 + $0x28] sm:$0x3]  ;;  %v911_v28 = vsel %vm511_vm7, %v909_v23, %v910_v27  ;;  %1129 = vmatpush1.msra.mxu0 %v1100_v36 }
 0x218   : > { %v715_v53 = vrot.slane %v1858_v51, 1  ;;  %1514 = vmatprep.mubr.msk.f32.mxu0 %vm214_vm0, %v1858_v51  ;;  %v913_v63 = vrot.slane %v1858_v51, 2  ;;  %v917_v25 = vrot.slane %v885_v21, 2  ;;  %v884_v26 = vld [vmem:[#allocation2 + $0x20] sm:$0x3]  ;;  %1130 = vmatprep.subr.mxu0 %v1635_v0  ;;  %v1070_v48 = vld [vmem:[#allocation3 + $0x398] sm:$0xff] }
 0x219   : > { %877 = vmatmul.mubr.f32.gmra.mxu0 %v1856_v49  ;;  %v718_v5 = vsel %vm312_vm6, %v712_v57, %v717_v61  ;;  %v915_v29 = vrot.slane %v884_v26, 2  ;;  %v1069_v49 = vld [vmem:[#allocation3 + $0x390] sm:$0xff]  ;;  %v1068_v50 = vld [vmem:[#allocation3 + $0x388] sm:$0xff]  ;;  %v1067_v51 = vld [vmem:[#allocation3 + $0x380] sm:$0xff] }
 0x21a   : > { %v716_v58 = vsel %vm312_vm6, %v714_v54, %v715_v53  ;;  %v720_v1 = vsel %vm312_vm6, %v715_v53, %v719_v55  ;;  %v914_v6 = vsel %vm511_vm7, %v912_v4, %v913_v63  ;;  %v918_v30 = vsel %vm511_vm7, %v913_v63, %v917_v25  ;;  %1131 = vmatpush1.msra.mxu0 %v1099_v37  ;;  %v1066_v61 = vld [vmem:[#allocation3 + $0x378] sm:$0xff]  ;;  %v1065_v63 = vld [vmem:[#allocation3 + $0x370] sm:$0xff] }
 0x21b   : > { %1511 = vmatprep.mubr.msk.f32.mxu1 %vm214_vm0, %v716_v58  ;;  %v916_v31 = vsel %vm511_vm7, %v910_v27, %v915_v29  ;;  %1132 = vmatprep.subr.mxu0 %v1635_v0  ;;  %v1091_v4 = vld [vmem:[#allocation3 + $0x418] sm:$0xff]  ;;  %v1086_v25 = vld [vmem:[#allocation3 + $0x3f0] sm:$0xff] }
 0x21c   : > { %792 = vmatmul.mubr.f32.vlgmr.msra.gmra.mxu1 %v713_v60  ;;  %1133 = vmatpush1.msra.mxu0 %v1098_v39  ;;  %v1093_v60 = vld [vmem:[#allocation3 + $0x428] sm:$0xff]  ;;  %v1087_v23 = vld [vmem:[#allocation3 + $0x3f8] sm:$0xff] }
 0x21d   : > { %926 = vmatpush1.msra.mxu1 %v902_v59  ;;  %1512 = vmatprep.mubr.msk.f32.mxu1 %vm214_vm0, %v720_v1  ;;  %v1103_v27 = vld [vmem:[#allocation3 + $0x478] sm:$0xff] }
 0x21e   : > { %927 = vmatprep.subr.mxu1 %v1635_v0  ;;  %1134 = vmatprep.subr.mxu0 %v1635_v0 }
 0x21f   : > { %928 = vmatpush1.msra.mxu1 %v901_v2  ;;  %1135 = vmatpush1.msra.mxu0 %v1097_v41 }
 0x220   : > { %929 = vmatprep.subr.mxu1 %v1635_v0  ;;  %797 = vmatmul.mubr.f32.gmra.mxu1 %v718_v5  ;;  %v1064_v5 = vld [vmem:[#allocation3 + $0x368] sm:$0xff] }
 0x221   : > { %930 = vmatpush1.msra.mxu1 %v900_v3  ;;  %1515 = vmatprep.mubr.msk.f32.mxu1 %vm214_vm0, %v914_v6  ;;  %v1518_v3 = vld [vmem:[%s2023_s2 + $0x1] ss:$0 sm:$0xff] }
 0x222   : > { %931 = vmatprep.subr.mxu1 %v1635_v0  ;;  %1136 = vmatprep.subr.mxu0 %v1635_v0 }
 0x223   : > { %932 = vmatpush1.msra.mxu1 %v899_v7  ;;  %1137 = vmatpush1.msra.mxu0 %v1096_v43  ;;  %v1301_v43 = vld [vmem:[#allocation3 + $0x4f8] sm:$0xff] }
 0x224   : > { %933 = vmatprep.subr.mxu1 %v1635_v0  ;;  %1138 = vmatprep.subr.mxu0 %v1635_v0 }
 0x225   : > { %934 = vmatpush1.msra.mxu1 %v898_v8  ;;  %1139 = vmatpush1.msra.mxu0 %v1095_v45  ;;  %v1520_v8 = vld [vmem:[%s2024_s3 + $0x1] ss:$0 sm:$0xff] }
 0x226   : > { %935 = vmatprep.subr.mxu1 %v1635_v0  ;;  %1140 = vmatprep.subr.mxu0 %v1635_v0 }
 0x227   : > { %936 = vmatpush1.msra.mxu1 %v897_v9  ;;  %1141 = vmatpush1.msra.mxu0 %v1094_v47  ;;  %v1090_v9 = vld [vmem:[#allocation3 + $0x410] sm:$0xff]  ;;  %v1299_v47 = vld [vmem:[#allocation3 + $0x4e8] sm:$0xff] }
 0x228   : > { %937 = vmatprep.subr.mxu1 %v1635_v0  ;;  %1142 = vmatprep.subr.mxu0 %v1635_v0 }
 0x229   : > { %938 = vmatpush1.msra.mxu1 %v896_v10  ;;  %1143 = vmatpush1.msra.mxu0 %v1093_v60  ;;  %v1063_v10 = vld [vmem:[#allocation3 + $0x360] sm:$0xff] }
 0x22a   : > { %939 = vmatprep.subr.mxu1 %v1635_v0  ;;  %1144 = vmatprep.subr.mxu0 %v1635_v0 }
 0x22b   : > { %940 = vmatpush1.msra.mxu1 %v895_v11  ;;  %1145 = vmatpush1.msra.mxu0 %v1092_v62 }
 0x22c   : > { %941 = vmatprep.subr.mxu1 %v1635_v0  ;;  %1146 = vmatprep.subr.mxu0 %v1635_v0 }
 0x22d   : > { %942 = vmatpush1.msra.mxu1 %v894_v12  ;;  %1147 = vmatpush1.msra.mxu0 %v1091_v4 }
 0x22e   : > { %943 = vmatprep.subr.mxu1 %v1635_v0  ;;  %1148 = vmatprep.subr.mxu0 %v1635_v0 }
 0x22f   : > { %944 = vmatpush1.msra.mxu1 %v893_v13  ;;  %1149 = vmatpush1.msra.mxu0 %v1090_v9 }
 0x230   : > { %945 = vmatprep.subr.mxu1 %v1635_v0  ;;  %1150 = vmatprep.subr.mxu0 %v1635_v0 }
 0x231   : > { %946 = vmatpush1.msra.mxu1 %v892_v14  ;;  %v1089_v14 = vld [vmem:[#allocation3 + $0x408] sm:$0xff] }
 0x232   : > { %947 = vmatprep.subr.mxu1 %v1635_v0  ;;  %1151 = vmatpush1.msra.mxu0 %v1089_v14  ;;  %v1289_v14 = vld [vmem:[#allocation3 + $0x498] sm:$0xff] }
 0x233   : > { %948 = vmatpush1.msra.mxu1 %v891_v15  ;;  %v1080_v15 = vld [vmem:[#allocation3 + $0x3e8] sm:$0xff]  ;;  %1152 = vmatprep.subr.mxu0 %v1635_v0 }
 0x234   : > { %949 = vmatprep.subr.mxu1 %v1635_v0 }
 0x235   : > { %950 = vmatpush1.msra.mxu1 %v890_v16  ;;  %v1088_v16 = vld [vmem:[#allocation3 + $0x400] sm:$0xff] }
 0x236   : > { %951 = vmatprep.subr.mxu1 %v1635_v0  ;;  %1153 = vmatpush1.msra.mxu0 %v1088_v16  ;;  %v1287_v16 = vld [vmem:[#allocation3 + $0x488] sm:$0xff] }
 0x237   : > { %952 = vmatpush1.msra.mxu1 %v889_v17  ;;  %1154 = vmatprep.subr.mxu0 %v1635_v0 }
 0x238   : > { %953 = vmatprep.subr.mxu1 %v1635_v0  ;;  %1155 = vmatpush1.msra.mxu0 %v1087_v23 }
 0x239   : > { %954 = vmatpush1.msra.mxu1 %v888_v18  ;;  %1156 = vmatprep.subr.mxu0 %v1635_v0 }
 0x23a   : > { %955 = vmatprep.subr.mxu1 %v1635_v0  ;;  %1157 = vmatpush1.msra.mxu0 %v1086_v25 }
 0x23b   : > { %956 = vmatpush1.msra.mxu1 %v887_v19  ;;  %v1079_v19 = vld [vmem:[#allocation3 + $0x3e0] sm:$0xff]  ;;  %1186 = vmatprep.subr.mxu0 %v1635_v0 }
 0x23c   : > { %985 = vmatprep.subr.mxu1 %v1635_v0  ;;  %1187 = vmatpush2.msra.mxu0 %v1103_v27 }
 0x23d   : > { %986 = vmatpush2.msra.mxu1 %v904_v22  ;;  %1188 = vmatprep.subr.mxu0 %v1635_v0 }
 0x23e   : > { %987 = vmatprep.subr.mxu1 %v1635_v0 }
 0x23f   : > { %988 = vmatpush2.msra.mxu1 %v903_v24 }
 0x240   : > { %990 = vmatmul.mubr.f32.vlgmr.msra.gmra.mxu1 %v911_v28  ;;  %1206 = vmatprep.subr.mxu1 %v1635_v0  ;;  %v1102_v28 = vld [vmem:[#allocation3 + $0x470] sm:$0xff] }
 0x241   : > { %1516 = vmatprep.mubr.msk.f32.mxu1 %vm214_vm0, %v918_v30  ;;  %1207 = vmatpush1.msra.mxu1 %v1078_v32 }
 0x242   : > { %1208 = vmatprep.subr.mxu1 %v1635_v0  ;;  %1189 = vmatpush2.msra.mxu0 %v1102_v28 }
 0x243   : > { %1209 = vmatpush1.msra.mxu1 %v1077_v33  ;;  %1324 = vmatprep.subr.mxu0 %v1635_v0 }
 0x244   : > { %995 = vmatmul.mubr.f32.gmra.mxu1 %v916_v31  ;;  %1210 = vmatprep.subr.mxu1 %v1635_v0 }
 0x245   : > { %1211 = vmatpush1.msra.mxu1 %v1076_v35 }
 0x246   : > { %1212 = vmatprep.subr.mxu1 %v1635_v0 }
 0x247   : > { %1213 = vmatpush1.msra.mxu1 %v1075_v38 }
 0x248   : > { %1214 = vmatprep.subr.mxu1 %v1635_v0 }
 0x249   : > { %1215 = vmatpush1.msra.mxu1 %v1074_v40 }
 0x24a   : > { %1216 = vmatprep.subr.mxu1 %v1635_v0 }
 0x24b   : > { %1217 = vmatpush1.msra.mxu1 %v1073_v42 }
 0x24c   : > { %1218 = vmatprep.subr.mxu1 %v1635_v0 }
 0x24d   : > { %1219 = vmatpush1.msra.mxu1 %v1072_v44  ;;  %v1300_v44 = vld [vmem:[#allocation3 + $0x4f0] sm:$0xff] }
 0x24e   : > { %1220 = vmatprep.subr.mxu1 %v1635_v0 }
 0x24f   : > { %1221 = vmatpush1.msra.mxu1 %v1071_v46 }
 0x250   : > { %1222 = vmatprep.subr.mxu1 %v1635_v0 }
 0x251   : > { %1223 = vmatpush1.msra.mxu1 %v1070_v48 }
 0x252   : > { %1224 = vmatprep.subr.mxu1 %v1635_v0 }
 0x253   : > { %1225 = vmatpush1.msra.mxu1 %v1069_v49 }
 0x254   : > { %1226 = vmatprep.subr.mxu1 %v1635_v0 }
 0x255   : > { %1227 = vmatpush1.msra.mxu1 %v1068_v50 }
 0x256   : > { %1228 = vmatprep.subr.mxu1 %v1635_v0 }
 0x257   : > { %1229 = vmatpush1.msra.mxu1 %v1067_v51 }
 0x258   : > { %1230 = vmatprep.subr.mxu1 %v1635_v0 }
 0x259   : > { %1231 = vmatpush1.msra.mxu1 %v1066_v61  ;;  %v1297_v61 = vld [vmem:[#allocation3 + $0x4d8] sm:$0xff] }
 0x25a   : > { %1232 = vmatprep.subr.mxu1 %v1635_v0 }
 0x25b   : > { %1233 = vmatpush1.msra.mxu1 %v1065_v63 }
 0x25c   : > { %1234 = vmatprep.subr.mxu1 %v1635_v0 }
 0x25d   : > { %1235 = vmatpush1.msra.mxu1 %v1064_v5  ;;  %v1295_v5 = vld [vmem:[#allocation3 + $0x4c8] sm:$0xff] }
 0x25e   : > { %1236 = vmatprep.subr.mxu1 %v1635_v0 }
 0x25f   : > { %1237 = vmatpush1.msra.mxu1 %v1063_v10  ;;  %v1293_v10 = vld [vmem:[#allocation3 + $0x4b8] sm:$0xff] }
 0x260   : > { %1266 = vmatprep.subr.mxu1 %v1635_v0 }
 0x261   : > { %1267 = vmatpush2.msra.mxu1 %v1080_v15  ;;  %v1288_v15 = vld [vmem:[#allocation3 + $0x490] sm:$0xff] }
 0x262   : > { %1268 = vmatprep.subr.mxu1 %v1635_v0 }
 0x263   : > { %1269 = vmatpush2.msra.mxu1 %v1079_v19  ;;  %v1303_v19 = vld [vmem:[#allocation3 + $0x508] sm:$0xff] }
 0x264   : > { %1535 = vmatprep.subr.mxu1 %v1635_v0 }
 0x2d4   : > { %v873_v52 = vpop.f32.mrf.mxu0 }
 0x2d6   : > { %v875_v53 = vpop.f32.mrf.mxu0 }
 0x2d9   : > { %v878_v54 = vpop.f32.mrf.mxu0 }
 0x2db   : > { %v880_v55 = vpop.f32.mrf.mxu0 }
 0x2dc   : > { %v793_v56 = vpop.f32.mrf.mxu1 }
 0x2dd   : > { %v874_v1 = vadd.f32 %v873_v52, %v793_v56 }
 0x2de   : > { %v795_v57 = vpop.f32.mrf.mxu1 }
 0x2e0   : > { %v798_v58 = vpop.f32.mrf.mxu1 }
 0x2e1   : > { %v879_v11 = vadd.f32 %v878_v54, %v798_v58  ;;  %v1298_v54 = vld [vmem:[#allocation3 + $0x4e0] sm:$0xff] }
 0x2e2   : > { %v800_v59 = vpop.f32.mrf.mxu1 }
 0x300   : > { %v991_v2 = vpop.f32.mrf.mxu1 }
 0x301   : > { %v1000_v6 = vadd.f32 %v991_v2, %v874_v1  ;;  %v1296_v2 = vld [vmem:[#allocation3 + $0x4d0] sm:$0xff] }
 0x302   : > { %v993_v7 = vpop.f32.mrf.mxu1 }
 0x303   : > { %v1010_v12 = vmul.f32 %v1518_v3, %v1000_v6 }
 0x304   : > { %v996_v13 = vpop.f32.mrf.mxu1 }
 0x305   : > { %v1001_v17 = vadd.f32 %v996_v13, %v879_v11  ;;  %v1020_v18 = vadd.f32 %v1520_v8, %v1010_v12  ;;  %v1292_v11 = vld [vmem:[#allocation3 + $0x4b0] sm:$0xff]  ;;  %v1291_v12 = vld [vmem:[#allocation3 + $0x4a8] sm:$0xff]  ;;  %v1290_v13 = vld [vmem:[#allocation3 + $0x4a0] sm:$0xff] }
 0x306   : > { %v998_v20 = vpop.f32.mrf.mxu1 }
 0x307   : > { %v1011_v21 = vmul.f32 %v1518_v3, %v1001_v17  ;;  %v1022_v22 = vmax.f32 %v1020_v18, 0.0  ;;  %v1286_v17 = vld [vmem:[#allocation3 + $0x480] sm:$0xff] }
 0x309   : > { %1026 = vrot.lane.b32.xlu0 %v1022_v22, %s1636_s29  ;;  %v1021_v24 = vadd.f32 %v1520_v8, %v1011_v21  ;;  %v1294_v8 = vld [vmem:[#allocation3 + $0x4c0] sm:$0xff] }
 0x30a   : > { %v1302_v21 = vld [vmem:[#allocation3 + $0x500] sm:$0xff] }
 0x30b   : > { %v1023_v26 = vmax.f32 %v1021_v24, 0.0 }
 0x30d   : > { %1028 = vrot.lane.b32.xlu1 %v1023_v26, %s1636_s29 }
 0x37b   : > { %v1027_v29 = vpop.permute.xlu0 %1026 }
 0x37c   : > { %v1032_v30 = vsel %vm231_vm2, 0.0, %v1027_v29  ;;  %v1034_v31 = vsel %vm231_vm2, %v1027_v29, 0.0 }
 0x37d   : > { %v1040_v32 = vrot.slane %v1032_v30, 7  ;;  %v1041_v33 = vrot.slane %v1034_v31, 7 }
 0x37f   : > { %1052 = vst [vmem:[#allocation2] sm:$0xfe] %v1040_v32  ;;  %1053 = vst.msk [vmem:[#allocation2 + $0x8] sm:$0xfe] %vm254_vm3, %v1041_v33  ;;  %v1029_v34 = vpop.permute.xlu1 %1028 }
 0x380   : > { %v1033_v35 = vsel %vm231_vm2, 0.0, %v1029_v34  ;;  %v1035_v36 = vsel %vm231_vm2, %v1029_v34, 0.0 }
 0x381   : > { %v1042_v37 = vrot.slane %v1033_v35, 7  ;;  %v1044_v38 = vrot.slane %v1035_v36, 7 }
 0x383   : > { %v1951_v39 = vsel %vm240_vm4, %v1040_v32, %v1042_v37  ;;  %v1045_v40 = vsel %vm240_vm4, %v1041_v33, %v1044_v38  ;;  %1056 = vst [vmem:[#allocation2 + $0x20] sm:$0x1] %v1042_v37  ;;  %1057 = vst.msk [vmem:[#allocation2 + $0x28] sm:$0x1] %vm259_vm5, %v1044_v38  ;;  %v1528_v37 = vld [vmem:[%s2023_s2 + $0x2] ss:$0 sm:$0xff] }
 0x384   : > { %1055 = vst.msk [vmem:[#allocation2 + $0x18] sm:$0xff] %vm214_vm0, %v1045_v40  ;;  %v1111_v58 = vrot.slane %v1951_v39, 1  ;;  %v1309_v22 = vrot.slane %v1951_v39, 2  ;;  %v1530_v38 = vld [vmem:[%s2024_s3 + $0x2] ss:$0 sm:$0xff] }
 0x386   : > { %v1059_v41 = vld [vmem:[#allocation2 + $0x8] sm:$0xff]  ;;  %v1058_v42 = vld [vmem:[#allocation2] sm:$0xff] }
 0x387   : > { %1523 = vmatprep.mubr.msk.f32.mxu1 %vm214_vm0, %v1059_v41  ;;  %v1082_v45 = vld [vmem:[#allocation2 + $0x8] sm:$0xfe]  ;;  %v1081_v46 = vld [vmem:[#allocation2] sm:$0xfe] }
 0x388   : > { %1271 = vmatmul.mubr.f32.vlgmr.msra.gmra.mxu1 %v1058_v42  ;;  %v1113_v55 = vrot.slane %v1082_v45, 1  ;;  %v1110_v56 = vrot.slane %v1081_v46, 1  ;;  %v1282_v4 = vld [vmem:[#allocation2 + $0x8] sm:$0xfc]  ;;  %v1281_v24 = vld [vmem:[#allocation2] sm:$0xfc] }
 0x389   : > { %1553 = vmatpush1.msra.mxu1 %v1301_v43  ;;  %v1311_v7 = vrot.slane %v1282_v4, 2  ;;  %v1308_v25 = vrot.slane %v1281_v24, 2 }
 0x38a   : > { %1536 = vmatprep.subr.mxu1 %v1635_v0  ;;  %v1284_v48 = vld [vmem:[#allocation2 + $0x28] sm:$0x3]  ;;  %v1083_v62 = vld [vmem:[#allocation2 + $0x20] sm:$0x1]  ;;  %v1112_v63 = vsel %vm312_vm6, %v1110_v56, %v1111_v58 }
 0x38b   : > { %v1084_v49 = vld [vmem:[#allocation2 + $0x28] sm:$0x1]  ;;  %1554 = vmatpush1.msra.mxu1 %v1300_v44  ;;  %v1061_v50 = vld [vmem:[#allocation2 + $0x18] sm:$0xff]  ;;  %v1316_v51 = vrot.slane %v1284_v48, 2  ;;  %v1116_v3 = vrot.slane %v1083_v62, 1  ;;  %v1310_v26 = vsel %vm511_vm7, %v1308_v25, %v1309_v22 }
 0x38c   : > { %1537 = vmatprep.subr.mxu1 %v1635_v0  ;;  %v1114_v52 = vrot.slane %v1061_v50, 1  ;;  %1524 = vmatprep.mubr.msk.f32.mxu1 %vm214_vm0, %v1061_v50  ;;  %v1312_v53 = vrot.slane %v1061_v50, 2  ;;  %v1118_v57 = vrot.slane %v1084_v49, 1  ;;  %v1283_v18 = vld [vmem:[#allocation2 + $0x20] sm:$0x3] }
 0x38d   : > { %1555 = vmatpush1.msra.mxu1 %v1299_v47  ;;  %v1117_v6 = vsel %vm312_vm6, %v1111_v58, %v1116_v3  ;;  %v1314_v20 = vrot.slane %v1283_v18, 2 }
 0x38e   : > { %1276 = vmatmul.mubr.f32.gmra.mxu1 %v1951_v39  ;;  %1538 = vmatprep.subr.mxu1 %v1635_v0  ;;  %v1115_v59 = vsel %vm312_vm6, %v1113_v55, %v1114_v52  ;;  %v1317_v60 = vsel %vm511_vm7, %v1312_v53, %v1316_v51  ;;  %v1119_v1 = vsel %vm312_vm6, %v1114_v52, %v1118_v57 }
 0x38f   : > { %1556 = vmatpush1.msra.mxu1 %v1298_v54  ;;  %1521 = vmatprep.mubr.msk.f32.mxu0 %vm214_vm0, %v1115_v59  ;;  %v1313_v9 = vsel %vm511_vm7, %v1311_v7, %v1312_v53  ;;  %v1315_v23 = vsel %vm511_vm7, %v1309_v22, %v1314_v20 }
 0x390   : > { %1539 = vmatprep.subr.mxu1 %v1635_v0  ;;  %1526 = vmatprep.mubr.msk.f32.mxu1 %vm214_vm0, %v1317_v60 }
 0x391   : > { %1191 = vmatmul.mubr.f32.vlgmr.msra.gmra.mxu0 %v1112_v63  ;;  %1557 = vmatpush1.msra.mxu1 %v1297_v61 }
 0x392   : > { %1325 = vmatpush1.msra.mxu0 %v1301_v43  ;;  %1522 = vmatprep.mubr.msk.f32.mxu0 %vm214_vm0, %v1119_v1 }
 0x393   : > { %1326 = vmatprep.subr.mxu0 %v1635_v0  ;;  %1540 = vmatprep.subr.mxu1 %v1635_v0 }
 0x394   : > { %1327 = vmatpush1.msra.mxu0 %v1300_v44  ;;  %1558 = vmatpush1.msra.mxu1 %v1296_v2 }
 0x395   : > { %1328 = vmatprep.subr.mxu0 %v1635_v0  ;;  %1541 = vmatprep.subr.mxu1 %v1635_v0 }
 0x396   : > { %1196 = vmatmul.mubr.f32.gmra.mxu0 %v1117_v6  ;;  %1559 = vmatpush1.msra.mxu1 %v1295_v5 }
 0x397   : > { %1329 = vmatpush1.msra.mxu0 %v1299_v47  ;;  %1542 = vmatprep.subr.mxu1 %v1635_v0 }
 0x398   : > { %1330 = vmatprep.subr.mxu0 %v1635_v0  ;;  %1525 = vmatprep.mubr.msk.f32.mxu0 %vm214_vm0, %v1313_v9 }
 0x399   : > { %1331 = vmatpush1.msra.mxu0 %v1298_v54  ;;  %1560 = vmatpush1.msra.mxu1 %v1294_v8 }
 0x39a   : > { %1332 = vmatprep.subr.mxu0 %v1635_v0  ;;  %1543 = vmatprep.subr.mxu1 %v1635_v0 }
 0x39b   : > { %1333 = vmatpush1.msra.mxu0 %v1297_v61  ;;  %1561 = vmatpush1.msra.mxu1 %v1293_v10 }
 0x39c   : > { %1334 = vmatprep.subr.mxu0 %v1635_v0  ;;  %1544 = vmatprep.subr.mxu1 %v1635_v0 }
 0x39d   : > { %1335 = vmatpush1.msra.mxu0 %v1296_v2  ;;  %1562 = vmatpush1.msra.mxu1 %v1292_v11 }
 0x39e   : > { %1336 = vmatprep.subr.mxu0 %v1635_v0  ;;  %1545 = vmatprep.subr.mxu1 %v1635_v0 }
 0x39f   : > { %1337 = vmatpush1.msra.mxu0 %v1295_v5  ;;  %1563 = vmatpush1.msra.mxu1 %v1291_v12 }
 0x3a0   : > { %1338 = vmatprep.subr.mxu0 %v1635_v0  ;;  %1546 = vmatprep.subr.mxu1 %v1635_v0 }
 0x3a1   : > { %1339 = vmatpush1.msra.mxu0 %v1294_v8  ;;  %1564 = vmatpush1.msra.mxu1 %v1290_v13 }
 0x3a2   : > { %1340 = vmatprep.subr.mxu0 %v1635_v0  ;;  %1547 = vmatprep.subr.mxu1 %v1635_v0 }
 0x3a3   : > { %1341 = vmatpush1.msra.mxu0 %v1293_v10  ;;  %1565 = vmatpush1.msra.mxu1 %v1289_v14 }
 0x3a4   : > { %1342 = vmatprep.subr.mxu0 %v1635_v0  ;;  %1548 = vmatprep.subr.mxu1 %v1635_v0 }
 0x3a5   : > { %1343 = vmatpush1.msra.mxu0 %v1292_v11  ;;  %1566 = vmatpush1.msra.mxu1 %v1288_v15 }
 0x3a6   : > { %1344 = vmatprep.subr.mxu0 %v1635_v0  ;;  %1549 = vmatprep.subr.mxu1 %v1635_v0 }
 0x3a7   : > { %1345 = vmatpush1.msra.mxu0 %v1291_v12  ;;  %1567 = vmatpush1.msra.mxu1 %v1287_v16 }
 0x3a8   : > { %1346 = vmatprep.subr.mxu0 %v1635_v0  ;;  %1550 = vmatprep.subr.mxu1 %v1635_v0 }
 0x3a9   : > { %1347 = vmatpush1.msra.mxu0 %v1290_v13  ;;  %1568 = vmatpush1.msra.mxu1 %v1286_v17 }
 0x3aa   : > { %1348 = vmatprep.subr.mxu0 %v1635_v0  ;;  %1551 = vmatprep.subr.mxu1 %v1635_v0 }
 0x3ab   : > { %1349 = vmatpush1.msra.mxu0 %v1289_v14  ;;  %1569 = vmatpush2.msra.mxu1 %v1303_v19 }
 0x3ac   : > { %1350 = vmatprep.subr.mxu0 %v1635_v0  ;;  %1552 = vmatprep.subr.mxu1 %v1635_v0 }
 0x3ad   : > { %1351 = vmatpush1.msra.mxu0 %v1288_v15  ;;  %1570 = vmatpush2.msra.mxu1 %v1302_v21 }
 0x3ae   : > { %1352 = vmatprep.subr.mxu0 %v1635_v0  ;;  %1394 = vmatmul.mubr.f32.vlgmr.msra.gmra.mxu1 %v1315_v23 }
 0x3af   : > { %1353 = vmatpush1.msra.mxu0 %v1287_v16 }
 0x3b0   : > { %1354 = vmatprep.subr.mxu0 %v1635_v0 }
 0x3b1   : > { %1355 = vmatpush1.msra.mxu0 %v1286_v17 }
 0x3b2   : > { %1384 = vmatprep.subr.mxu0 %v1635_v0 }
 0x3b3   : > { %1385 = vmatpush2.msra.mxu0 %v1303_v19 }
 0x3b4   : > { %1386 = vmatprep.subr.mxu0 %v1635_v0 }
 0x3b5   : > { %1387 = vmatpush2.msra.mxu0 %v1302_v21 }
 0x3b6   : > { %1389 = vmatmul.mubr.f32.vlgmr.msra.gmra.mxu0 %v1310_v26 }
 0x448   : > { %v1272_v27 = vpop.f32.mrf.mxu1 }
 0x44a   : > { %v1274_v28 = vpop.f32.mrf.mxu1 }
 0x44e   : > { %v1277_v29 = vpop.f32.mrf.mxu1 }
 0x450   : > { %v1279_v30 = vpop.f32.mrf.mxu1 }
 0x451   : > { %v1192_v31 = vpop.f32.mrf.mxu0 }
 0x452   : > { %v1273_v42 = vadd.f32 %v1272_v27, %v1192_v31 }
 0x453   : > { %v1194_v32 = vpop.f32.mrf.mxu0 }
 0x456   : > { %v1197_v33 = vpop.f32.mrf.mxu0 }
 0x457   : > { %v1278_v35 = vadd.f32 %v1277_v29, %v1197_v33 }
 0x458   : > { %v1199_v34 = vpop.f32.mrf.mxu0 }
 0x46e   : > { %v1395_v36 = vpop.f32.mrf.mxu1 }
 0x46f   : > { %v1400_v0 = vadd.f32 %v1395_v36, %v1278_v35 }
 0x470   : > { %v1397_v39 = vpop.f32.mrf.mxu1 }
 0x471   : > { %v1410_v40 = vmul.f32 %v1528_v37, %v1400_v0 }
 0x473   : > { %v1420_v41 = vadd.f32 %v1530_v38, %v1410_v40 }
 0x475   : > { %v1422_v43 = vmax.f32 %v1420_v41, 0.0 }
 0x476   : > { %v1390_v44 = vpop.f32.mrf.mxu0 }
 0x477   : > { %1424 = vst [vmem:[%s212_s20 + $0x8] sm:$0xff] %v1422_v43  ;;  %v1399_v45 = vadd.f32 %v1390_v44, %v1273_v42 }
 0x478   : > { %v1392_v46 = vpop.f32.mrf.mxu0 }
 0x479   : > { %v1409_v47 = vmul.f32 %v1528_v37, %v1399_v45 }
 0x47b   : > { %v1419_v48 = vadd.f32 %v1530_v38, %v1409_v47 }
 0x47d   : > { %v1421_v49 = vmax.f32 %v1419_v48, 0.0 }
 0x47f   : > { %1423 = vst [vmem:[%s212_s20] sm:$0xff] %v1421_v49 }
 0x480 PF: > { %s15_s15 = sadd.s32 1, %s1630_s15  }
 0x481   : > { %p12_p1 = scmp.ge.s32.totalorder %s15_s15, 4  }
 0x483   :  { %14 = sbr.rel (!%p12_p1) target bundleno = 1 (0x1), region = 83 }
 0x488   :  { %1446 = vsyncpa [#allocation4], 1 }
 0x489   :  { %1448 = vsyncpa [#allocation4 + $0x1], 1 }

</bundles_post_ra>
